<compile_context>
chip_gen: v5e
topology: v5e:2x2
jax: 0.10.0
libtpu: 0.0.40
codegen_flags: <defaults>
</compile_context>

<pallas_src>
import functools

import jax
import jax.numpy as jnp
from jax.experimental import pallas as pl
from jax.experimental.pallas import tpu as pltpu

LANE = 128        # TPU lane width (last-dim tiling unit)
SUBLANE = 8       # TPU sublane width (second-to-last dim tiling unit)
TB_DEFAULT = 512  # max batch tile (rows per grid step)


def _round_up(n, m):
    return ((n + m - 1) // m) * m


# ----------------------------------------------------------------------------
# Kernel
# ----------------------------------------------------------------------------
def vae_kernel(
    # batch-tiled inputs
    x_ref, eps_ref,
    # resident weights (constant index_map -> stay in VMEM across grid steps)
    w1_ref, w2_ref, wmv_ref, wd1_ref, wd2_ref, wout_ref,
    # all biases packed into one (8, maxw) f32 slab
    bias_ref,
    # batch-tiled outputs
    xhat_ref, stats_ref,
    *, latent_dim, hidden_p, mv_p, out_p, approx_sigmoid,
):
    f32 = jnp.float32
    biases = bias_ref[...]          # (8, maxw) f32, loaded once per grid step

    def mm(a, w_ref, row, cols):
        # f32 accumulation on the MXU; bias row broadcasts over the batch tile.
        acc = jnp.dot(a.astype(w_ref.dtype), w_ref[...], preferred_element_type=f32)
        return acc + biases[row:row + 1, :cols]

    def lrelu(v):
        # equivalent to where(v>0, v, 0.2*v) for slope < 1; one fewer VPU op.
        return jnp.maximum(v, 0.2 * v)

    x = x_ref[...].astype(f32)

    # ---- Encoder ----
    h = lrelu(mm(x, w1_ref, 0, hidden_p))
    h = lrelu(mm(h, w2_ref, 1, hidden_p))

    # Fused mean / log_var projection: lanes [0:L)=mean, [L:2L)=log_var, rest zero.
    mv = mm(h, wmv_ref, 2, mv_p)
    L = latent_dim
    mean = mv[:, :L]
    log_var = mv[:, L:2 * L]

    # ---- Reparameterization: z = mean + exp(0.5*log_var) * eps ----
    eps = eps_ref[...][:, :L]       # lane-dense 128-wide load, in-register slice
    z = mean + jnp.exp(0.5 * log_var) * eps

    # ---- Decoder ----
    d = lrelu(mm(z, wd1_ref, 3, hidden_p))
    d = lrelu(mm(d, wd2_ref, 4, hidden_p))
    logits = mm(d, wout_ref, 5, out_p)

    one_plus = 1.0 + jnp.exp(-logits)
    if approx_sigmoid:
        x_hat = pl.reciprocal(one_plus, approx=True)   # EUP slot (bf16 path only)
    else:
        x_hat = 1.0 / one_plus                         # exact (f32 path)

    # ---- Lane-dense output writes ----
    xhat_ref[...] = x_hat.astype(xhat_ref.dtype)

    # stats layout: [mean | log_var | z | 0 ...]
    if stats_ref.shape[-1] == mv.shape[-1] and 3 * L <= mv.shape[-1]:
        # Reuse the already-computed [mean | log_var | 0...] slab (no zeros/concat),
        # then insert z with one small slice store.
        stats_ref[...] = mv.astype(stats_ref.dtype)
        stats_ref[:, 2 * L:3 * L] = z.astype(stats_ref.dtype)
    else:
        pad_w = stats_ref.shape[-1] - 3 * L
        parts = [mean, log_var, z]
        if pad_w > 0:
            parts.append(jnp.zeros((mean.shape[0], pad_w), f32))
        stats_ref[...] = jnp.concatenate(parts, axis=-1).astype(stats_ref.dtype)


# ----------------------------------------------------------------------------
# One-time parameter preparation (transpose, fuse, pad, pack) -- hoisted out of
# the per-call path.  compute_dtype=jnp.bfloat16 halves weight DMA/VMEM and runs
# the MXU in its native datapath on v5e/v6e/v7x (accumulation stays f32).
# ----------------------------------------------------------------------------
def prepare_params(params, *, input_dim, hidden_dim, latent_dim,
                   compute_dtype=jnp.float32):
    din_p = _round_up(input_dim, LANE)
    hp = _round_up(hidden_dim, LANE)
    mvp = _round_up(2 * latent_dim, LANE)
    maxw = max(din_p, hp, mvp)

    def wt(w, rows_p, cols_p):
        # PyTorch (out, in) -> (in, out), zero-pad to (rows_p, cols_p).
        w = jnp.asarray(w, jnp.float32).T
        w = jnp.pad(w, ((0, rows_p - w.shape[0]), (0, cols_p - w.shape[1])))
        return w.astype(compute_dtype)

    def brow(b):
        b = jnp.asarray(b, jnp.float32).reshape(-1)
        return jnp.pad(b, (0, maxw - b.shape[0]))

    # Fuse mean/var projections along the output axis: (hidden, 2*latent).
    w_mv = jnp.concatenate(
        [jnp.asarray(params["w_mean"], jnp.float32).T,
         jnp.asarray(params["w_var"], jnp.float32).T], axis=1)
    b_mv = jnp.concatenate(
        [jnp.asarray(params["b_mean"], jnp.float32),
         jnp.asarray(params["b_var"], jnp.float32)], axis=0)

    bias_rows = [
        brow(params["b_in"]), brow(params["b_in2"]), brow(b_mv),
        brow(params["b_h1"]), brow(params["b_h2"]), brow(params["b_out"]),
    ]
    while len(bias_rows) < SUBLANE:
        bias_rows.append(jnp.zeros((maxw,), jnp.float32))
    bias_pack = jnp.stack(bias_rows, axis=0)   # (8, maxw) f32

    return dict(
        w1=wt(params["w_in"], din_p, hp),
        w2=wt(params["w_in2"], hp, hp),
        wmv=jnp.pad(w_mv, ((0, hp - w_mv.shape[0]),
                           (0, mvp - w_mv.shape[1]))).astype(compute_dtype),
        wd1=wt(params["w_h1"], latent_dim, hp),
        wd2=wt(params["w_h2"], hp, hp),
        wout=wt(params["w_out"], hp, din_p),
        biases=bias_pack,
    )


# ----------------------------------------------------------------------------
# Forward pass (jitted)
# ----------------------------------------------------------------------------
@jax.jit
def vae_forward(x, eps, prepped):
    B, input_dim = x.shape
    latent_dim = eps.shape[1]
    din_p, hp = prepped["w1"].shape
    mvp = prepped["wmv"].shape[1]
    eps_p = _round_up(latent_dim, LANE)
    stats_w = _round_up(3 * latent_dim, LANE)

    # Batch tiling: big tiles (per-step compute >> per-step overhead), but ensure at
    # least 2 grid steps when B allows it so both v7x TensorCores are used.
    tb = min(TB_DEFAULT, max(SUBLANE, _round_up((B + 1) // 2, SUBLANE)))
    b_pad = _round_up(B, tb)
    grid = (b_pad // tb,)

    # Pad activations (batch to tile multiple, features to lane multiple).
    xf = x.astype(jnp.float32)
    if (b_pad, din_p) != (B, input_dim):
        xf = jnp.zeros((b_pad, din_p), jnp.float32).at[:B, :input_dim].set(xf)
    # eps padded to a full 128-lane slab -> lane-dense, unmasked loads.
    ef = jnp.zeros((b_pad, eps_p), jnp.float32).at[:B, :latent_dim].set(
        eps.astype(jnp.float32))

    def act_spec(cols):
        return pl.BlockSpec((tb, cols), lambda i: (i, 0))

    def resident_spec(arr):
        nd = arr.ndim
        return pl.BlockSpec(arr.shape, lambda i, _n=nd: (0,) * _n)

    in_specs = [
        act_spec(din_p),                  # x
        act_spec(eps_p),                  # eps (lane-dense)
        resident_spec(prepped["w1"]),
        resident_spec(prepped["w2"]),
        resident_spec(prepped["wmv"]),
        resident_spec(prepped["wd1"]),
        resident_spec(prepped["wd2"]),
        resident_spec(prepped["wout"]),
        resident_spec(prepped["biases"]),
    ]
    out_shapes = (
        jax.ShapeDtypeStruct((b_pad, din_p), jnp.float32),    # x_hat (padded)
        jax.ShapeDtypeStruct((b_pad, stats_w), jnp.float32),  # [mean|logvar|z|pad]
    )
    out_specs = (act_spec(din_p), act_spec(stats_w))

    # Advisory cost estimate for the XLA scheduler.
    flops = 2 * b_pad * (din_p * hp + hp * hp + hp * mvp +
                         latent_dim * hp + hp * hp + hp * din_p)
    transcendentals = b_pad * (latent_dim + din_p)
    weight_bytes = sum(int(v.size) * v.dtype.itemsize for v in prepped.values())
    bytes_accessed = weight_bytes + 4 * b_pad * (din_p + eps_p + din_p + stats_w)

    approx_sigmoid = prepped["w1"].dtype != jnp.float32   # gate on tolerance
    kernel = functools.partial(
        vae_kernel, latent_dim=latent_dim, hidden_p=hp, mv_p=mvp, out_p=din_p,
        approx_sigmoid=bool(approx_sigmoid))

    x_hat_p, stats_p = pl.pallas_call(
        kernel,
        out_shape=out_shapes,
        grid=grid,
        in_specs=in_specs,
        out_specs=out_specs,
        compiler_params=pltpu.CompilerParams(
            dimension_semantics=("parallel",),
        ),
        cost_estimate=pl.CostEstimate(
            flops=int(flops),
            transcendentals=int(transcendentals),
            bytes_accessed=int(bytes_accessed),
        ),
    )(
        xf, ef,
        prepped["w1"], prepped["w2"], prepped["wmv"],
        prepped["wd1"], prepped["wd2"], prepped["wout"],
        prepped["biases"],
    )

    L = latent_dim
    x_hat = x_hat_p[:B, :input_dim]
    mean = stats_p[:B, :L]
    log_var = stats_p[:B, L:2 * L]
    z = stats_p[:B, 2 * L:3 * L]
    return x_hat, mean, log_var, z


# ----------------------------------------------------------------------------
# Synthetic init + pure-JAX reference (PyTorch convention)
# ----------------------------------------------------------------------------
def _init_params(key, input_dim, hidden_dim, latent_dim):
    def linear(k, out_f, in_f):
        k1, k2 = jax.random.split(k)
        bound = 1.0 / jnp.sqrt(in_f)
        w = jax.random.uniform(k1, (out_f, in_f), jnp.float32, -bound, bound)
        b = jax.random.uniform(k2, (out_f,), jnp.float32, -bound, bound)
        return w, b

    keys = jax.random.split(key, 7)
    p = {}
    p["w_in"], p["b_in"] = linear(keys[0], hidden_dim, input_dim)
    p["w_in2"], p["b_in2"] = linear(keys[1], hidden_dim, hidden_dim)
    p["w_mean"], p["b_mean"] = linear(keys[2], latent_dim, hidden_dim)
    p["w_var"], p["b_var"] = linear(keys[3], latent_dim, hidden_dim)
    p["w_h1"], p["b_h1"] = linear(keys[4], hidden_dim, latent_dim)
    p["w_h2"], p["b_h2"] = linear(keys[5], hidden_dim, hidden_dim)
    p["w_out"], p["b_out"] = linear(keys[6], input_dim, hidden_dim)
    return p


def _reference(x, eps, p):
    """Pure-JAX reference of the PyTorch forward (epsilon passed explicitly)."""
    lrelu = lambda v: jnp.where(v > 0, v, 0.2 * v)
    lin = lambda h, w, b: h @ w.T + b
    h = lrelu(lin(x, p["w_in"], p["b_in"]))
    h = lrelu(lin(h, p["w_in2"], p["b_in2"]))
    mean = lin(h, p["w_mean"], p["b_mean"])
    log_var = lin(h, p["w_var"], p["b_var"])
    z = mean + jnp.exp(0.5 * log_var) * eps
    d = lrelu(lin(z, p["w_h1"], p["b_h1"]))
    d = lrelu(lin(d, p["w_h2"], p["b_h2"]))
    x_hat = jax.nn.sigmoid(lin(d, p["w_out"], p["b_out"]))
    return x_hat, mean, log_var, z


if __name__ == "__main__":
    # Small but multi-tile: B=256 -> tb=128, grid=(2,)  (both TCs on v7x).
    B, INPUT_DIM, HIDDEN_DIM, LATENT_DIM = 256, 128, 64, 32

    key = jax.random.PRNGKey(0)
    k_x, k_eps, k_p = jax.random.split(key, 3)

    x = jax.random.normal(k_x, (B, INPUT_DIM), jnp.float32)
    # torch.randn_like(var) in the module is stochastic; here epsilon is drawn
    # deterministically in JAX and fed into the kernel.
    eps = jax.random.normal(k_eps, (B, LATENT_DIM), jnp.float32)
    params = _init_params(k_p, INPUT_DIM, HIDDEN_DIM, LATENT_DIM)

    r_xhat, r_mean, r_logvar, r_z = _reference(x, eps, params)

    # --- f32 weight path: tight correctness check ---
    prepped_f32 = prepare_params(params, input_dim=INPUT_DIM, hidden_dim=HIDDEN_DIM,
                                 latent_dim=LATENT_DIM, compute_dtype=jnp.float32)
    x_hat, mean, log_var, z = vae_forward(x, eps, prepped_f32)
    jax.block_until_ready((x_hat, mean, log_var, z))
    assert jnp.allclose(x_hat, r_xhat, atol=1e-4, rtol=1e-4)
    assert jnp.allclose(mean, r_mean, atol=1e-4, rtol=1e-4)
    assert jnp.allclose(log_var, r_logvar, atol=1e-4, rtol=1e-4)
    assert jnp.allclose(z, r_z, atol=1e-4, rtol=1e-4)

    # --- bf16 weight path (MXU-native on v5e/v6e/v7x): loose correctness check ---
    prepped_bf16 = prepare_params(params, input_dim=INPUT_DIM, hidden_dim=HIDDEN_DIM,
                                  latent_dim=LATENT_DIM, compute_dtype=jnp.bfloat16)
    xb, mb, lvb, zb = vae_forward(x, eps, prepped_bf16)
    jax.block_until_ready((xb, mb, lvb, zb))
    assert jnp.allclose(xb, r_xhat, atol=5e-2, rtol=5e-2)
    assert jnp.allclose(mb, r_mean, atol=5e-2, rtol=5e-2)
    assert jnp.allclose(lvb, r_logvar, atol=5e-2, rtol=5e-2)
    assert jnp.allclose(zb, r_z, atol=5e-2, rtol=5e-2)

    print("KERNEL_OK")
</pallas_src>

<mosaic_0001>
module attributes {stable_mosaic.version = 11 : i64} {
  func.func @vae_kernel(%arg0: i32, %arg1: memref<128x128xf32, #tpu.memory_space<vmem>>, %arg2: memref<128x128xf32, #tpu.memory_space<vmem>>, %arg3: memref<128x128xf32, #tpu.memory_space<vmem>>, %arg4: memref<128x128xf32, #tpu.memory_space<vmem>>, %arg5: memref<128x128xf32, #tpu.memory_space<vmem>>, %arg6: memref<32x128xf32, #tpu.memory_space<vmem>>, %arg7: memref<128x128xf32, #tpu.memory_space<vmem>>, %arg8: memref<128x128xf32, #tpu.memory_space<vmem>>, %arg9: memref<8x128xf32, #tpu.memory_space<vmem>>, %arg10: memref<128x128xf32, #tpu.memory_space<vmem>>, %arg11: memref<128x128xf32, #tpu.memory_space<vmem>>) attributes {dimension_semantics = [#tpu.dimension_semantics<parallel>], iteration_bounds = array<i64: 2>, scalar_prefetch = 0 : i64, scratch_operands = 0 : i64, tpu.core_type = #tpu.core_type<tc>, window_params = [{transform_indices = @transform_0, window_bounds = array<i64: 128, 128>}, {transform_indices = @transform_1, window_bounds = array<i64: 128, 128>}, {pipeline_mode = #tpu.pipeline_mode<synchronous>, transform_indices = @transform_2, window_bounds = array<i64: 128, 128>}, {pipeline_mode = #tpu.pipeline_mode<synchronous>, transform_indices = @transform_3, window_bounds = array<i64: 128, 128>}, {pipeline_mode = #tpu.pipeline_mode<synchronous>, transform_indices = @transform_4, window_bounds = array<i64: 128, 128>}, {pipeline_mode = #tpu.pipeline_mode<synchronous>, transform_indices = @transform_5, window_bounds = array<i64: 32, 128>}, {pipeline_mode = #tpu.pipeline_mode<synchronous>, transform_indices = @transform_6, window_bounds = array<i64: 128, 128>}, {pipeline_mode = #tpu.pipeline_mode<synchronous>, transform_indices = @transform_7, window_bounds = array<i64: 128, 128>}, {pipeline_mode = #tpu.pipeline_mode<synchronous>, transform_indices = @transform_8, window_bounds = array<i64: 8, 128>}, {transform_indices = @transform_9, window_bounds = array<i64: 128, 128>}, {transform_indices = @transform_10, window_bounds = array<i64: 128, 128>}]} {
    %c0 = arith.constant 0 : index
    %c0_0 = arith.constant 0 : index
    %0 = vector.load %arg9[%c0, %c0_0] : memref<8x128xf32, #tpu.memory_space<vmem>>, vector<8x128xf32>
    %c0_1 = arith.constant 0 : index
    %c0_2 = arith.constant 0 : index
    %1 = vector.load %arg1[%c0_1, %c0_2] : memref<128x128xf32, #tpu.memory_space<vmem>>, vector<128x128xf32>
    %c0_3 = arith.constant 0 : index
    %c0_4 = arith.constant 0 : index
    %2 = vector.load %arg3[%c0_3, %c0_4] : memref<128x128xf32, #tpu.memory_space<vmem>>, vector<128x128xf32>
    %cst = arith.constant dense<0.000000e+00> : vector<128x128xf32>
    %3 = tpu.matmul %1, %2, %cst {dimension_numbers = #tpu.dot_dimension_numbers<[1], [0], [0], [1], [0, 0, 1, 1], [], []>} : vector<128x128xf32>, vector<128x128xf32>, vector<128x128xf32> -> vector<128x128xf32>
    %4 = vector.extract_strided_slice %0 {offsets = [0, 0], sizes = [1, 128], strides = [1, 1]} : vector<8x128xf32> to vector<1x128xf32>
    %5 = vector.broadcast %4 : vector<1x128xf32> to vector<128x128xf32>
    %6 = arith.addf %3, %5 : vector<128x128xf32>
    %cst_5 = arith.constant 2.000000e-01 : f32
    %7 = vector.broadcast %cst_5 : f32 to vector<128x128xf32>
    %8 = arith.mulf %7, %6 : vector<128x128xf32>
    %9 = arith.maximumf %6, %8 : vector<128x128xf32>
    %c0_6 = arith.constant 0 : index
    %c0_7 = arith.constant 0 : index
    %10 = vector.load %arg4[%c0_6, %c0_7] : memref<128x128xf32, #tpu.memory_space<vmem>>, vector<128x128xf32>
    %cst_8 = arith.constant dense<0.000000e+00> : vector<128x128xf32>
    %11 = tpu.matmul %9, %10, %cst_8 {dimension_numbers = #tpu.dot_dimension_numbers<[1], [0], [0], [1], [0, 0, 1, 1], [], []>} : vector<128x128xf32>, vector<128x128xf32>, vector<128x128xf32> -> vector<128x128xf32>
    %12 = vector.extract_strided_slice %0 {offsets = [1, 0], sizes = [1, 128], strides = [1, 1]} : vector<8x128xf32> to vector<1x128xf32>
    %13 = vector.broadcast %12 : vector<1x128xf32> to vector<128x128xf32>
    %14 = arith.addf %11, %13 : vector<128x128xf32>
    %cst_9 = arith.constant 2.000000e-01 : f32
    %15 = vector.broadcast %cst_9 : f32 to vector<128x128xf32>
    %16 = arith.mulf %15, %14 : vector<128x128xf32>
    %17 = arith.maximumf %14, %16 : vector<128x128xf32>
    %c0_10 = arith.constant 0 : index
    %c0_11 = arith.constant 0 : index
    %18 = vector.load %arg5[%c0_10, %c0_11] : memref<128x128xf32, #tpu.memory_space<vmem>>, vector<128x128xf32>
    %cst_12 = arith.constant dense<0.000000e+00> : vector<128x128xf32>
    %19 = tpu.matmul %17, %18, %cst_12 {dimension_numbers = #tpu.dot_dimension_numbers<[1], [0], [0], [1], [0, 0, 1, 1], [], []>} : vector<128x128xf32>, vector<128x128xf32>, vector<128x128xf32> -> vector<128x128xf32>
    %20 = vector.extract_strided_slice %0 {offsets = [2, 0], sizes = [1, 128], strides = [1, 1]} : vector<8x128xf32> to vector<1x128xf32>
    %21 = vector.broadcast %20 : vector<1x128xf32> to vector<128x128xf32>
    %22 = arith.addf %19, %21 : vector<128x128xf32>
    %23 = vector.extract_strided_slice %22 {offsets = [0, 0], sizes = [128, 32], strides = [1, 1]} : vector<128x128xf32> to vector<128x32xf32>
    %24 = vector.extract_strided_slice %22 {offsets = [0, 32], sizes = [128, 32], strides = [1, 1]} : vector<128x128xf32> to vector<128x32xf32>
    %c0_13 = arith.constant 0 : index
    %c0_14 = arith.constant 0 : index
    %25 = vector.load %arg2[%c0_13, %c0_14] : memref<128x128xf32, #tpu.memory_space<vmem>>, vector<128x128xf32>
    %26 = vector.extract_strided_slice %25 {offsets = [0, 0], sizes = [128, 32], strides = [1, 1]} : vector<128x128xf32> to vector<128x32xf32>
    %cst_15 = arith.constant 5.000000e-01 : f32
    %27 = vector.broadcast %cst_15 : f32 to vector<128x32xf32>
    %28 = arith.mulf %27, %24 : vector<128x32xf32>
    %29 = math.exp %28 : vector<128x32xf32>
    %30 = arith.mulf %29, %26 : vector<128x32xf32>
    %31 = arith.addf %23, %30 : vector<128x32xf32>
    %c0_16 = arith.constant 0 : index
    %c0_17 = arith.constant 0 : index
    %32 = vector.load %arg6[%c0_16, %c0_17] : memref<32x128xf32, #tpu.memory_space<vmem>>, vector<32x128xf32>
    %cst_18 = arith.constant dense<0.000000e+00> : vector<128x128xf32>
    %33 = tpu.matmul %31, %32, %cst_18 {dimension_numbers = #tpu.dot_dimension_numbers<[1], [0], [0], [1], [0, 0, 1, 1], [], []>} : vector<128x32xf32>, vector<32x128xf32>, vector<128x128xf32> -> vector<128x128xf32>
    %34 = vector.extract_strided_slice %0 {offsets = [3, 0], sizes = [1, 128], strides = [1, 1]} : vector<8x128xf32> to vector<1x128xf32>
    %35 = vector.broadcast %34 : vector<1x128xf32> to vector<128x128xf32>
    %36 = arith.addf %33, %35 : vector<128x128xf32>
    %cst_19 = arith.constant 2.000000e-01 : f32
    %37 = vector.broadcast %cst_19 : f32 to vector<128x128xf32>
    %38 = arith.mulf %37, %36 : vector<128x128xf32>
    %39 = arith.maximumf %36, %38 : vector<128x128xf32>
    %c0_20 = arith.constant 0 : index
    %c0_21 = arith.constant 0 : index
    %40 = vector.load %arg7[%c0_20, %c0_21] : memref<128x128xf32, #tpu.memory_space<vmem>>, vector<128x128xf32>
    %cst_22 = arith.constant dense<0.000000e+00> : vector<128x128xf32>
    %41 = tpu.matmul %39, %40, %cst_22 {dimension_numbers = #tpu.dot_dimension_numbers<[1], [0], [0], [1], [0, 0, 1, 1], [], []>} : vector<128x128xf32>, vector<128x128xf32>, vector<128x128xf32> -> vector<128x128xf32>
    %42 = vector.extract_strided_slice %0 {offsets = [4, 0], sizes = [1, 128], strides = [1, 1]} : vector<8x128xf32> to vector<1x128xf32>
    %43 = vector.broadcast %42 : vector<1x128xf32> to vector<128x128xf32>
    %44 = arith.addf %41, %43 : vector<128x128xf32>
    %cst_23 = arith.constant 2.000000e-01 : f32
    %45 = vector.broadcast %cst_23 : f32 to vector<128x128xf32>
    %46 = arith.mulf %45, %44 : vector<128x128xf32>
    %47 = arith.maximumf %44, %46 : vector<128x128xf32>
    %c0_24 = arith.constant 0 : index
    %c0_25 = arith.constant 0 : index
    %48 = vector.load %arg8[%c0_24, %c0_25] : memref<128x128xf32, #tpu.memory_space<vmem>>, vector<128x128xf32>
    %cst_26 = arith.constant dense<0.000000e+00> : vector<128x128xf32>
    %49 = tpu.matmul %47, %48, %cst_26 {dimension_numbers = #tpu.dot_dimension_numbers<[1], [0], [0], [1], [0, 0, 1, 1], [], []>} : vector<128x128xf32>, vector<128x128xf32>, vector<128x128xf32> -> vector<128x128xf32>
    %50 = vector.extract_strided_slice %0 {offsets = [5, 0], sizes = [1, 128], strides = [1, 1]} : vector<8x128xf32> to vector<1x128xf32>
    %51 = vector.broadcast %50 : vector<1x128xf32> to vector<128x128xf32>
    %52 = arith.addf %49, %51 : vector<128x128xf32>
    %cst_27 = arith.constant 0.000000e+00 : f32
    %53 = vector.broadcast %cst_27 : f32 to vector<128x128xf32>
    %54 = arith.subf %53, %52 : vector<128x128xf32>
    %55 = math.exp %54 : vector<128x128xf32>
    %cst_28 = arith.constant 1.000000e+00 : f32
    %56 = vector.broadcast %cst_28 : f32 to vector<128x128xf32>
    %57 = arith.addf %56, %55 : vector<128x128xf32>
    %cst_29 = arith.constant 1.000000e+00 : f32
    %58 = vector.broadcast %cst_29 : f32 to vector<128x128xf32>
    %59 = arith.divf %58, %57 : vector<128x128xf32>
    %c0_30 = arith.constant 0 : index
    %c0_31 = arith.constant 0 : index
    %60 = vector.load %arg10[%c0_30, %c0_31] : memref<128x128xf32, #tpu.memory_space<vmem>>, vector<128x128xf32>
    tpu.vector_store %arg10[%c0_30, %c0_31], %59 {strides = array<i32>} : memref<128x128xf32, #tpu.memory_space<vmem>>, vector<128x128xf32>,
    %c0_32 = arith.constant 0 : index
    %c0_33 = arith.constant 0 : index
    %61 = vector.load %arg11[%c0_32, %c0_33] : memref<128x128xf32, #tpu.memory_space<vmem>>, vector<128x128xf32>
    tpu.vector_store %arg11[%c0_32, %c0_33], %22 {strides = array<i32>} : memref<128x128xf32, #tpu.memory_space<vmem>>, vector<128x128xf32>,
    %c0_34 = arith.constant 0 : index
    %c64 = arith.constant 64 : index
    %62 = vector.load %arg11[%c0_34, %c64] : memref<128x128xf32, #tpu.memory_space<vmem>>, vector<128x32xf32>
    tpu.vector_store %arg11[%c0_34, %c64], %31 {strides = array<i32>} : memref<128x128xf32, #tpu.memory_space<vmem>>, vector<128x32xf32>,
    return
  }
  func.func @transform_0(%arg0: i32) -> (i32, i32) {
    %c0_i32 = arith.constant 0 : i32
    %c0_i32_0 = arith.constant 0 : i32
    return %arg0, %c0_i32 : i32, i32
  }
  func.func @transform_1(%arg0: i32) -> (i32, i32) {
    %c0_i32 = arith.constant 0 : i32
    %c0_i32_0 = arith.constant 0 : i32
    return %arg0, %c0_i32 : i32, i32
  }
  func.func @transform_2(%arg0: i32) -> (i32, i32) {
    %c0_i32 = arith.constant 0 : i32
    %c0_i32_0 = arith.constant 0 : i32
    %c0_i32_1 = arith.constant 0 : i32
    return %c0_i32, %c0_i32_0 : i32, i32
  }
  func.func @transform_3(%arg0: i32) -> (i32, i32) {
    %c0_i32 = arith.constant 0 : i32
    %c0_i32_0 = arith.constant 0 : i32
    %c0_i32_1 = arith.constant 0 : i32
    return %c0_i32, %c0_i32_0 : i32, i32
  }
  func.func @transform_4(%arg0: i32) -> (i32, i32) {
    %c0_i32 = arith.constant 0 : i32
    %c0_i32_0 = arith.constant 0 : i32
    %c0_i32_1 = arith.constant 0 : i32
    return %c0_i32, %c0_i32_0 : i32, i32
  }
  func.func @transform_5(%arg0: i32) -> (i32, i32) {
    %c0_i32 = arith.constant 0 : i32
    %c0_i32_0 = arith.constant 0 : i32
    %c0_i32_1 = arith.constant 0 : i32
    return %c0_i32, %c0_i32_0 : i32, i32
  }
  func.func @transform_6(%arg0: i32) -> (i32, i32) {
    %c0_i32 = arith.constant 0 : i32
    %c0_i32_0 = arith.constant 0 : i32
    %c0_i32_1 = arith.constant 0 : i32
    return %c0_i32, %c0_i32_0 : i32, i32
  }
  func.func @transform_7(%arg0: i32) -> (i32, i32) {
    %c0_i32 = arith.constant 0 : i32
    %c0_i32_0 = arith.constant 0 : i32
    %c0_i32_1 = arith.constant 0 : i32
    return %c0_i32, %c0_i32_0 : i32, i32
  }
  func.func @transform_8(%arg0: i32) -> (i32, i32) {
    %c0_i32 = arith.constant 0 : i32
    %c0_i32_0 = arith.constant 0 : i32
    %c0_i32_1 = arith.constant 0 : i32
    return %c0_i32, %c0_i32_0 : i32, i32
  }
  func.func @transform_9(%arg0: i32) -> (i32, i32) {
    %c0_i32 = arith.constant 0 : i32
    %c0_i32_0 = arith.constant 0 : i32
    return %arg0, %c0_i32 : i32, i32
  }
  func.func @transform_10(%arg0: i32) -> (i32, i32) {
    %c0_i32 = arith.constant 0 : i32
    %c0_i32_0 = arith.constant 0 : i32
    return %arg0, %c0_i32 : i32, i32
  }
}

</mosaic_0001>

<bundles_post_ra>
// kernel: vae_forward.1
= control target key start
LH: loop header
LB: loop body
LE: loop exit
PB: predicated region body
PF: predicated region fallthrough
CT: control target
= control target key end

     0   :  { %16 = vsyncpa [#allocation3], 0  ;;  %s2870_s0 = inlined_call_operand.vmem [shape: f32[256,128], index: 0, kind: input, shape index: {}]   ;;  %s2871_s1 = inlined_call_operand.vmem [shape: f32[256,128], index: 1, kind: input, shape index: {}]   ;;  %s2872_s2 = inlined_call_operand.vmem [shape: f32[128,128], index: 2, kind: input, shape index: {}]   ;;  %s2873_s3 = inlined_call_operand.vmem [shape: f32[128,128], index: 3, kind: input, shape index: {}]   ;;  %s2874_s4 = inlined_call_operand.vmem [shape: f32[128,128], index: 4, kind: input, shape index: {}]   ;;  %s2875_s5 = inlined_call_operand.vmem [shape: f32[32,128], index: 5, kind: input, shape index: {}]   ;;  %s2876_s6 = inlined_call_operand.vmem [shape: f32[128,128], index: 6, kind: input, shape index: {}]   ;;  %s2877_s7 = inlined_call_operand.vmem [shape: f32[128,128], index: 7, kind: input, shape index: {}]   ;;  %s2878_s8 = inlined_call_operand.vmem [shape: f32[8,128], index: 8, kind: input, shape index: {}]   ;;  %s2879_s9 = inlined_call_operand.hbm [shape: f32[256,128], index: 9, kind: output, shape index: {0}]   ;;  %s2880_s10 = inlined_call_operand.vmem [shape: f32[256,128], index: 10, kind: output, shape index: {1}]  }
   0x1   :  { %18 = vsyncpa [#allocation3 + $0x1], 0  ;;  %s2138_s13 = smov 0   ;;  %s2140_s14 = smov 0  }
   0x2   :  { %s2142_s15 = smov 0   ;;  %s2144_s16 = smov 0  }
   0x3 LB: > { %s2159_s17 = sadd.s32 4294967295, %s2076_s16   ;;  %s1820_s18 = sadd.s32 4294967294, %s2076_s16   ;;  %s2076_s16 = sphi %s2144_s16, %s2886_s16   ;;  %s2072_s15 = sphi %s2142_s15, %s2885_s15   ;;  %s2068_s14 = sphi %s2140_s14, %s2884_s14   ;;  %s2064_s13 = sphi %s2138_s13, %s2883_s13  }
   0x4   : > { %s2163_s19 = sadd.s32 1, %s2076_s16   ;;  %s230_s20 = sadd.s32 1, %s2072_s15 }
   0x5   : > { %s227_s21 = ssub.s32 %s2076_s16, %s2163_s19  ;;  %p240_p0 = scmp.ne.s32.totalorder %s2072_s15, %s2068_s14 }
   0x6   : > { %p228_p1 = scmp.eq.s32.totalorder %s227_s21, 0  ;;  %p241_p2 = scmp.eq.s32.totalorder %s2159_s17, 1 }
   0x7   : > { %p246_p3 = scmp.ne.s32.totalorder %s2068_s14, %s2064_s13  ;;  %p247_p4 = scmp.eq.s32.totalorder %s1820_s18, 1 }
   0x8   : > { %s2174_s22 = scalar_select %p228_p1, %s2072_s15, %s230_s20  }
   0x9   : > { %p2176_p5 = por %p241_p2, %p240_p0  ;;  %p2180_p6 = por %p247_p4, %p246_p3 }
   0xa   : > { %p1823_p7 = scmp.ge.s32.totalorder %s2076_s16, 1  ;;  %p330_p8 = scmp.lt.s32.totalorder %s2076_s16, 3 }
   0xc   : > { %p331_p9 = pnand %p1823_p7, %p330_p8 }
   0xd   : > { %s1825_s30 = sshll.u32 (!%p331_p9), %s2159_s17, 4  ;;  %s2078_s18 = smov (!%p331_p9), 32  }
   0xe   : > { %334 = sbr.rel (%p331_p9) target bundleno = 1251 (0x4e3), region = 56  ;;  %p379_p10 = scmp.lt.s32.totalorder (!%p331_p9), %s1825_s30, 31 }
   0xf   : > { %s368_s21 = sand.u32 (!%p331_p9), 1, %s2068_s14  }
  0x10   : > { %s1824_s26 = sshll.u32 (!%p331_p9), %s368_s21, 7  ;;  %s1697_s29 = scalar_lea.sflag (!%p331_p9), [#allocation3], %s368_s21 }
  0x13   : > { %v429_v0 = vld [vmem:[%s2872_s2 + $0x78] sm:$0xff]  ;;  %v428_v1 = vld [vmem:[%s2872_s2 + $0x70] sm:$0xff]  ;;  %v427_v2 = vld [vmem:[%s2872_s2 + $0x68] sm:$0xff]  ;;  %s2888_s30 = smov (!%p379_p10, %s1825_s30), 31  ;;  %vm953_vm0 = vcmask 261120   ;;  %vm1679_vm1 = vcmask 785920  }
  0x14   : > { %431 = vmatpush.msra.mxu0 %v429_v0  ;;  %1853 = vmatpush.msra.mxu1 %v429_v0  ;;  %v426_v3 = vld [vmem:[%s2872_s2 + $0x60] sm:$0xff]  ;;  %v425_v4 = vld [vmem:[%s2872_s2 + $0x58] sm:$0xff]  ;;  %v424_v5 = vld [vmem:[%s2872_s2 + $0x50] sm:$0xff]  ;;  %s2226_s11 = sshll.u32 %s2888_s30, 3  ;;  %s2034_s30 = scalar_lea.hbm %s2879_s9, 256 }
  0x15   : > { %v423_v6 = vld [vmem:[%s2872_s2 + $0x48] sm:$0xff]  ;;  %v422_v7 = vld [vmem:[%s2872_s2 + $0x40] sm:$0xff]  ;;  %v421_v8 = vld [vmem:[%s2872_s2 + $0x38] sm:$0xff]  ;;  %s2238_s27 = scalar_lea.vmem %s2870_s0, %s2226_s11  ;;  %s2386_s12 = scalar_lea.vmem %s2871_s1, %s2226_s11 }
  0x16   : > { %432 = vmatpush.msra.mxu0 %v428_v1  ;;  %1854 = vmatpush.msra.mxu1 %v428_v1  ;;  %v420_v9 = vld [vmem:[%s2872_s2 + $0x30] sm:$0xff]  ;;  %v419_v10 = vld [vmem:[%s2872_s2 + $0x28] sm:$0xff]  ;;  %v418_v11 = vld [vmem:[%s2872_s2 + $0x20] sm:$0xff]  ;;  %s2425_s25 = scalar_lea.vmem %s2880_s10, %s2226_s11  ;;  %s2079_s11 = smov 96  }
  0x17   : > { %v417_v12 = vld [vmem:[%s2872_s2 + $0x18] sm:$0xff]  ;;  %v416_v13 = vld [vmem:[%s2872_s2 + $0x10] sm:$0xff]  ;;  %v415_v14 = vld [vmem:[%s2872_s2 + $0x8] sm:$0xff] }
  0x18   : > { %433 = vmatpush.msra.mxu0 %v427_v2  ;;  %1855 = vmatpush.msra.mxu1 %v427_v2  ;;  %v414_v15 = vld [vmem:[%s2872_s2] sm:$0xff]  ;;  %v399_v17 = vld [vmem:[%s2238_s27 + $0x8] sm:$0xff]  ;;  %v400_v18 = vld [vmem:[%s2238_s27 + $0x10] sm:$0xff] }
  0x19   : > { %v398_v16 = vld [vmem:[%s2238_s27] sm:$0xff]  ;;  %v401_v19 = vld [vmem:[%s2238_s27 + $0x18] sm:$0xff]  ;;  %v542_v22 = vld [vmem:[%s2873_s3 + $0x70] sm:$0xff] }
  0x1a   : > { %434 = vmatpush.msra.mxu0 %v426_v3  ;;  %1856 = vmatpush.msra.mxu1 %v426_v3  ;;  %v406_v20 = vld [vmem:[%s2238_s27 + $0x40] sm:$0xff]  ;;  %v543_v21 = vld [vmem:[%s2873_s3 + $0x78] sm:$0xff]  ;;  %v541_v23 = vld [vmem:[%s2873_s3 + $0x68] sm:$0xff] }
  0x1b   : > { %v402_v24 = vld [vmem:[%s2238_s27 + $0x20] sm:$0xff]  ;;  %v407_v26 = vld [vmem:[%s2238_s27 + $0x48] sm:$0xff]  ;;  %v539_v27 = vld [vmem:[%s2873_s3 + $0x58] sm:$0xff] }
  0x1c   : > { %435 = vmatpush.msra.mxu0 %v425_v4  ;;  %1857 = vmatpush.msra.mxu1 %v425_v4  ;;  %v540_v25 = vld [vmem:[%s2873_s3 + $0x60] sm:$0xff]  ;;  %v538_v28 = vld [vmem:[%s2873_s3 + $0x50] sm:$0xff]  ;;  %v537_v29 = vld [vmem:[%s2873_s3 + $0x48] sm:$0xff] }
  0x1d   : > { %v403_v30 = vld [vmem:[%s2238_s27 + $0x28] sm:$0xff]  ;;  %v536_v31 = vld [vmem:[%s2873_s3 + $0x40] sm:$0xff]  ;;  %v408_v32 = vld [vmem:[%s2238_s27 + $0x50] sm:$0xff] }
  0x1e   : > { %436 = vmatpush.msra.mxu0 %v424_v5  ;;  %1858 = vmatpush.msra.mxu1 %v424_v5  ;;  %v535_v33 = vld [vmem:[%s2873_s3 + $0x38] sm:$0xff]  ;;  %v534_v34 = vld [vmem:[%s2873_s3 + $0x30] sm:$0xff]  ;;  %v533_v35 = vld [vmem:[%s2873_s3 + $0x28] sm:$0xff] }
  0x1f   : > { %v404_v36 = vld [vmem:[%s2238_s27 + $0x30] sm:$0xff]  ;;  %v532_v37 = vld [vmem:[%s2873_s3 + $0x20] sm:$0xff]  ;;  %v409_v38 = vld [vmem:[%s2238_s27 + $0x58] sm:$0xff] }
  0x20   : > { %437 = vmatpush.msra.mxu0 %v423_v6  ;;  %1859 = vmatpush.msra.mxu1 %v423_v6  ;;  %v531_v39 = vld [vmem:[%s2873_s3 + $0x18] sm:$0xff]  ;;  %v530_v40 = vld [vmem:[%s2873_s3 + $0x10] sm:$0xff]  ;;  %v529_v41 = vld [vmem:[%s2873_s3 + $0x8] sm:$0xff] }
  0x21   : > { %v405_v42 = vld [vmem:[%s2238_s27 + $0x38] sm:$0xff]  ;;  %v410_v43 = vld [vmem:[%s2238_s27 + $0x60] sm:$0xff]  ;;  %v411_v44 = vld [vmem:[%s2238_s27 + $0x68] sm:$0xff] }
  0x22   : > { %438 = vmatpush.msra.mxu0 %v422_v7  ;;  %1860 = vmatpush.msra.mxu1 %v422_v7  ;;  %v412_v45 = vld [vmem:[%s2238_s27 + $0x70] sm:$0xff]  ;;  %v413_v46 = vld [vmem:[%s2238_s27 + $0x78] sm:$0xff]  ;;  %v528_v47 = vld [vmem:[%s2873_s3] sm:$0xff]  ;;  %s1852_s27 = sshll.u32 %s2159_s17, 7 }
  0x23   : > { %v2310_v48 = vld [vmem:[%s2878_s8] sm:$0xff] }
  0x24   : > { %439 = vmatpush.msra.mxu0 %v421_v8  ;;  %1861 = vmatpush.msra.mxu1 %v421_v8  ;;  %v2313_v49 = vperm.slane %v2310_v48, 0 }
  0x26   : > { %440 = vmatpush.msra.mxu0 %v420_v9  ;;  %1862 = vmatpush.msra.mxu1 %v420_v9 }
  0x28   : > { %441 = vmatpush.msra.mxu0 %v419_v10  ;;  %1863 = vmatpush.msra.mxu1 %v419_v10 }
  0x2a   : > { %442 = vmatpush.msra.mxu0 %v418_v11  ;;  %1864 = vmatpush.msra.mxu1 %v418_v11 }
  0x2c   : > { %443 = vmatpush.msra.mxu0 %v417_v12  ;;  %1865 = vmatpush.msra.mxu1 %v417_v12 }
  0x2e   : > { %444 = vmatpush.msra.mxu0 %v416_v13  ;;  %1866 = vmatpush.msra.mxu1 %v416_v13 }
  0x30   : > { %445 = vmatpush.msra.mxu0 %v415_v14  ;;  %1867 = vmatpush.msra.mxu1 %v415_v14 }
  0x32   : > { %446 = vmatpush.msra.mxu0 %v414_v15  ;;  %1868 = vmatpush.msra.mxu1 %v414_v15 }
  0x33   : > { %447 = vmatmul.f32.vlgmr.msra.gmra.mxu0 %v398_v16  ;;  %471 = vmatmul.f32.vlgmr.msra.gmra.mxu1 %v406_v20 }
  0x34   : > { %545 = vmatpush.msrb.mxu1 %v543_v21 }
  0x36   : > { %546 = vmatpush.msrb.mxu1 %v542_v22 }
  0x38   : > { %547 = vmatpush.msrb.mxu1 %v541_v23 }
  0x3a   : > { %548 = vmatpush.msrb.mxu1 %v540_v25 }
  0x3b   : > { %450 = vmatmul.f32.gmra.mxu0 %v399_v17  ;;  %474 = vmatmul.f32.gmra.mxu1 %v407_v26  ;;  %v657_v26 = vld [vmem:[%s2874_s4 + $0x78] sm:$0xff] }
  0x3c   : > { %549 = vmatpush.msrb.mxu1 %v539_v27  ;;  %v656_v27 = vld [vmem:[%s2874_s4 + $0x70] sm:$0xff]  ;;  %659 = vmatpush.msra.mxu2 %v657_v26 }
  0x3e   : > { %550 = vmatpush.msrb.mxu1 %v538_v28  ;;  %660 = vmatpush.msra.mxu2 %v656_v27 }
  0x40   : > { %551 = vmatpush.msrb.mxu1 %v537_v29 }
  0x42   : > { %552 = vmatpush.msrb.mxu1 %v536_v31 }
  0x43   : > { %453 = vmatmul.f32.gmra.mxu0 %v400_v18  ;;  %477 = vmatmul.f32.gmra.mxu1 %v408_v32  ;;  %v655_v32 = vld [vmem:[%s2874_s4 + $0x68] sm:$0xff] }
  0x44   : > { %553 = vmatpush.msrb.mxu1 %v535_v33  ;;  %v654_v33 = vld [vmem:[%s2874_s4 + $0x60] sm:$0xff]  ;;  %661 = vmatpush.msra.mxu2 %v655_v32 }
  0x46   : > { %554 = vmatpush.msrb.mxu1 %v534_v34  ;;  %v653_v34 = vld [vmem:[%s2874_s4 + $0x58] sm:$0xff]  ;;  %662 = vmatpush.msra.mxu2 %v654_v33 }
  0x48   : > { %555 = vmatpush.msrb.mxu1 %v533_v35  ;;  %663 = vmatpush.msra.mxu2 %v653_v34 }
  0x4a   : > { %556 = vmatpush.msrb.mxu1 %v532_v37 }
  0x4b   : > { %456 = vmatmul.f32.gmra.mxu0 %v401_v19  ;;  %480 = vmatmul.f32.gmra.mxu1 %v409_v38  ;;  %v652_v38 = vld [vmem:[%s2874_s4 + $0x50] sm:$0xff] }
  0x4c   : > { %557 = vmatpush.msrb.mxu1 %v531_v39  ;;  %664 = vmatpush.msra.mxu2 %v652_v38 }
  0x4e   : > { %558 = vmatpush.msrb.mxu1 %v530_v40  ;;  %v651_v40 = vld [vmem:[%s2874_s4 + $0x48] sm:$0xff] }
  0x4f   : > { %665 = vmatpush.msra.mxu2 %v651_v40  ;;  %v728_v40 = vld [vmem:[%s2386_s12 + $0x20] sm:$0xff] }
  0x50   : > { %559 = vmatpush.msrb.mxu1 %v529_v41  ;;  %v650_v41 = vld [vmem:[%s2874_s4 + $0x40] sm:$0xff]  ;;  %812 = vrot.lane.b32.xlu2 %v728_v40, %s2078_s18 }
  0x51   : > { %666 = vmatpush.msra.mxu2 %v650_v41 }
  0x52   : > { %560 = vmatpush.msrb.mxu1 %v528_v47 }
  0x53   : > { %459 = vmatmul.f32.gmra.mxu0 %v402_v24  ;;  %483 = vmatmul.f32.gmra.mxu1 %v410_v43 }
  0x5b   : > { %462 = vmatmul.f32.gmra.mxu0 %v403_v30  ;;  %486 = vmatmul.f32.gmra.mxu1 %v411_v44 }
  0x63   : > { %465 = vmatmul.f32.gmra.mxu0 %v404_v36  ;;  %489 = vmatmul.f32.gmra.mxu1 %v412_v45  ;;  %v648_v45 = vld [vmem:[%s2874_s4 + $0x30] sm:$0xff] }
  0x6b   : > { %468 = vmatmul.f32.gmra.mxu0 %v405_v42  ;;  %492 = vmatmul.f32.gmra.mxu1 %v413_v46  ;;  %v649_v42 = vld [vmem:[%s2874_s4 + $0x38] sm:$0xff] }
  0x6c   : > { %667 = vmatpush.msra.mxu2 %v649_v42 }
  0x6e   : > { %668 = vmatpush.msra.mxu2 %v648_v45  ;;  %v729_v45 = vld [vmem:[%s2386_s12 + $0x28] sm:$0xff] }
  0x6f   : > { %814 = vrot.lane.b32.xlu2 %v729_v45, %s2078_s18 }
  0xb0   : > { %v448_v50 = vpop.f32.mrf.mxu0  ;;  %v472_v8 = vpop.f32.mrf.mxu1 }
  0xb1   : > { %v449_v51 = vadd.f32 %v448_v50, %v2313_v49  ;;  %v473_v19 = vadd.f32 %v472_v8, %v2313_v49  ;;  %v647_v50 = vld [vmem:[%s2874_s4 + $0x28] sm:$0xff] }
  0xb2   : > { %669 = vmatpush.msra.mxu2 %v647_v50 }
  0xb3   : > { %v496_v52 = vmul.f32 0.2, %v449_v51  ;;  %v504_v22 = vmul.f32 0.2, %v473_v19 }
  0xb5   : > { %v512_v53 = vmax.f32 %v449_v51, %v496_v52  ;;  %v520_v23 = vmax.f32 %v473_v19, %v504_v22  ;;  %v646_v51 = vld [vmem:[%s2874_s4 + $0x20] sm:$0xff]  ;;  %v727_v22 = vld [vmem:[%s2386_s12 + $0x18] sm:$0xff] }
  0xb6   : > { %670 = vmatpush.msra.mxu2 %v646_v51 }
  0xb7   : > { %561 = vmatmul.f32.vlgmr.msrb.gmra.mxu1 %v512_v53 }
  0xb8   : > { %v451_v54 = vpop.f32.mrf.mxu0  ;;  %v475_v14 = vpop.f32.mrf.mxu1 }
  0xb9   : > { %v452_v55 = vadd.f32 %v451_v54, %v2313_v49  ;;  %v476_v24 = vadd.f32 %v475_v14, %v2313_v49  ;;  %v645_v54 = vld [vmem:[%s2874_s4 + $0x18] sm:$0xff] }
  0xba   : > { %671 = vmatpush.msra.mxu2 %v645_v54 }
  0xbb   : > { %v497_v56 = vmul.f32 0.2, %v452_v55  ;;  %v505_v25 = vmul.f32 0.2, %v476_v24 }
  0xbd   : > { %v513_v57 = vmax.f32 %v452_v55, %v497_v56  ;;  %v521_v29 = vmax.f32 %v476_v24, %v505_v25  ;;  %v644_v55 = vld [vmem:[%s2874_s4 + $0x10] sm:$0xff] }
  0xbe   : > { %672 = vmatpush.msra.mxu2 %v644_v55 }
  0xbf   : > { %564 = vmatmul.f32.gmra.mxu1 %v513_v57 }
  0xc0   : > { %v454_v58 = vpop.f32.mrf.mxu0  ;;  %v478_v21 = vpop.f32.mrf.mxu1 }
  0xc1   : > { %v455_v59 = vadd.f32 %v454_v58, %v2313_v49  ;;  %v479_v30 = vadd.f32 %v478_v21, %v2313_v49  ;;  %v643_v58 = vld [vmem:[%s2874_s4 + $0x8] sm:$0xff] }
  0xc2   : > { %673 = vmatpush.msra.mxu2 %v643_v58 }
  0xc3   : > { %v498_v60 = vmul.f32 0.2, %v455_v59  ;;  %v506_v31 = vmul.f32 0.2, %v479_v30 }
  0xc5   : > { %v514_v61 = vmax.f32 %v455_v59, %v498_v60  ;;  %v522_v36 = vmax.f32 %v479_v30, %v506_v31  ;;  %v642_v59 = vld [vmem:[%s2874_s4] sm:$0xff] }
  0xc6   : > { %674 = vmatpush.msra.mxu2 %v642_v59 }
  0xc7   : > { %567 = vmatmul.f32.gmra.mxu1 %v514_v61 }
  0xc8   : > { %v457_v62 = vpop.f32.mrf.mxu0  ;;  %v481_v28 = vpop.f32.mrf.mxu1 }
  0xc9   : > { %v458_v63 = vadd.f32 %v457_v62, %v2313_v49  ;;  %v482_v37 = vadd.f32 %v481_v28, %v2313_v49 }
  0xcb   : > { %v499_v0 = vmul.f32 0.2, %v458_v63  ;;  %v507_v39 = vmul.f32 0.2, %v482_v37 }
  0xcd   : > { %v515_v1 = vmax.f32 %v458_v63, %v499_v0  ;;  %v523_v43 = vmax.f32 %v482_v37, %v507_v39 }
  0xcf   : > { %570 = vmatmul.f32.gmra.mxu1 %v515_v1 }
  0xd0   : > { %v460_v2 = vpop.f32.mrf.mxu0  ;;  %v484_v35 = vpop.f32.mrf.mxu1 }
  0xd1   : > { %v461_v3 = vadd.f32 %v460_v2, %v2313_v49  ;;  %v485_v44 = vadd.f32 %v484_v35, %v2313_v49  ;;  %v730_v35 = vld [vmem:[%s2386_s12 + $0x30] sm:$0xff] }
  0xd3   : > { %v500_v4 = vmul.f32 0.2, %v461_v3  ;;  %v508_v47 = vmul.f32 0.2, %v485_v44 }
  0xd5   : > { %v516_v5 = vmax.f32 %v461_v3, %v500_v4  ;;  %v524_v52 = vmax.f32 %v485_v44, %v508_v47  ;;  %v2380_v4 = vperm.slane %v2310_v48, 1 }
  0xd7   : > { %573 = vmatmul.f32.gmra.mxu1 %v516_v5 }
  0xd8   : > { %v463_v6 = vpop.f32.mrf.mxu0  ;;  %v487_v46 = vpop.f32.mrf.mxu1 }
  0xd9   : > { %v464_v7 = vadd.f32 %v463_v6, %v2313_v49  ;;  %v488_v53 = vadd.f32 %v487_v46, %v2313_v49 }
  0xdb   : > { %v501_v9 = vmul.f32 0.2, %v464_v7  ;;  %v509_v57 = vmul.f32 0.2, %v488_v53 }
  0xdd   : > { %v517_v10 = vmax.f32 %v464_v7, %v501_v9  ;;  %v525_v60 = vmax.f32 %v488_v53, %v509_v57 }
  0xdf   : > { %576 = vmatmul.f32.gmra.mxu1 %v517_v10 }
  0xe0   : > { %v466_v11 = vpop.f32.mrf.mxu0  ;;  %v490_v56 = vpop.f32.mrf.mxu1 }
  0xe1   : > { %v467_v12 = vadd.f32 %v466_v11, %v2313_v49  ;;  %v491_v61 = vadd.f32 %v490_v56, %v2313_v49 }
  0xe3   : > { %v502_v13 = vmul.f32 0.2, %v467_v12  ;;  %v510_v62 = vmul.f32 0.2, %v491_v61 }
  0xe5   : > { %v518_v15 = vmax.f32 %v467_v12, %v502_v13  ;;  %v526_v0 = vmax.f32 %v491_v61, %v510_v62  ;;  %v725_v12 = vld [vmem:[%s2386_s12 + $0x8] sm:$0xff] }
  0xe7   : > { %579 = vmatmul.f32.gmra.mxu1 %v518_v15 }
  0xe8   : > { %v469_v16 = vpop.f32.mrf.mxu0  ;;  %v493_v63 = vpop.f32.mrf.mxu1 }
  0xe9   : > { %v470_v17 = vadd.f32 %v469_v16, %v2313_v49  ;;  %v494_v1 = vadd.f32 %v493_v63, %v2313_v49  ;;  %v724_v49 = vld [vmem:[%s2386_s12] sm:$0xff] }
  0xea   : > { %804 = vrot.lane.b32.xlu0 %v724_v49, %s2078_s18 }
  0xeb   : > { %v503_v18 = vmul.f32 0.2, %v470_v17  ;;  %v511_v2 = vmul.f32 0.2, %v494_v1 }
  0xed   : > { %v519_v20 = vmax.f32 %v470_v17, %v503_v18  ;;  %v527_v3 = vmax.f32 %v494_v1, %v511_v2  ;;  %v726_v17 = vld [vmem:[%s2386_s12 + $0x10] sm:$0xff] }
  0xee   : > { %808 = vrot.lane.b32.xlu1 %v726_v17, %s2078_s18 }
  0xef   : > { %582 = vmatmul.f32.gmra.mxu1 %v519_v20 }
  0xf2   : > { %806 = vrot.lane.b32.xlu0 %v725_v12, %s2078_s18 }
  0xf6   : > { %810 = vrot.lane.b32.xlu1 %v727_v22, %s2078_s18 }
  0xf7   : > { %585 = vmatmul.f32.gmra.mxu1 %v520_v23 }
  0xfe   : > { %816 = vrot.lane.b32.xlu1 %v730_v35, %s2078_s18 }
  0xff   : > { %588 = vmatmul.f32.gmra.mxu1 %v521_v29 }
 0x107   : > { %591 = vmatmul.f32.gmra.mxu1 %v522_v36 }
 0x10f   : > { %594 = vmatmul.f32.gmra.mxu1 %v523_v43 }
 0x117   : > { %597 = vmatmul.f32.gmra.mxu1 %v524_v52 }
 0x11f   : > { %600 = vmatmul.f32.gmra.mxu1 %v525_v60 }
 0x127   : > { %603 = vmatmul.f32.gmra.mxu1 %v526_v0 }
 0x12f   : > { %606 = vmatmul.f32.gmra.mxu1 %v527_v3 }
 0x134   : > { %v562_v5 = vpop.f32.mrf.mxu1 }
 0x135   : > { %v563_v6 = vadd.f32 %v562_v5, %v2380_v4 }
 0x137   : > { %v610_v7 = vmul.f32 0.2, %v563_v6 }
 0x139   : > { %v626_v8 = vmax.f32 %v563_v6, %v610_v7 }
 0x13b   : > { %675 = vmatmul.f32.vlgmr.msra.gmra.mxu2 %v626_v8 }
 0x13c   : > { %v565_v9 = vpop.f32.mrf.mxu1 }
 0x13d   : > { %v566_v10 = vadd.f32 %v565_v9, %v2380_v4 }
 0x13f   : > { %v611_v11 = vmul.f32 0.2, %v566_v10 }
 0x141   : > { %v627_v13 = vmax.f32 %v566_v10, %v611_v11 }
 0x143   : > { %678 = vmatmul.f32.gmra.mxu2 %v627_v13  ;;  %v2419_v13 = vperm.slane %v2310_v48, 2 }
 0x144   : > { %v568_v14 = vpop.f32.mrf.mxu1 }
 0x145   : > { %v569_v15 = vadd.f32 %v568_v14, %v2380_v4 }
 0x147   : > { %v612_v16 = vmul.f32 0.2, %v569_v15 }
 0x149   : > { %v628_v18 = vmax.f32 %v569_v15, %v612_v16 }
 0x14b   : > { %681 = vmatmul.f32.gmra.mxu2 %v628_v18 }
 0x14c   : > { %v571_v19 = vpop.f32.mrf.mxu1 }
 0x14d   : > { %v572_v20 = vadd.f32 %v571_v19, %v2380_v4 }
 0x14f   : > { %v613_v21 = vmul.f32 0.2, %v572_v20 }
 0x151   : > { %v629_v23 = vmax.f32 %v572_v20, %v613_v21 }
 0x153   : > { %684 = vmatmul.f32.gmra.mxu2 %v629_v23 }
 0x154   : > { %v574_v24 = vpop.f32.mrf.mxu1 }
 0x155   : > { %v575_v25 = vadd.f32 %v574_v24, %v2380_v4 }
 0x157   : > { %v614_v26 = vmul.f32 0.2, %v575_v25 }
 0x159   : > { %v630_v27 = vmax.f32 %v575_v25, %v614_v26 }
 0x15b   : > { %687 = vmatmul.f32.gmra.mxu2 %v630_v27 }
 0x15c   : > { %v577_v28 = vpop.f32.mrf.mxu1  ;;  %v805_v19 = vpop.permute.xlu0 %804 }
 0x15d   : > { %v578_v29 = vadd.f32 %v577_v28, %v2380_v4 }
 0x15f   : > { %v615_v30 = vmul.f32 0.2, %v578_v29 }
 0x161   : > { %v631_v31 = vmax.f32 %v578_v29, %v615_v30  ;;  %v731_v30 = vld [vmem:[%s2386_s12 + $0x38] sm:$0xff] }
 0x163   : > { %690 = vmatmul.f32.gmra.mxu2 %v631_v31 }
 0x164   : > { %v580_v32 = vpop.f32.mrf.mxu1  ;;  %v807_v27 = vpop.permute.xlu0 %806 }
 0x165   : > { %v581_v33 = vadd.f32 %v580_v32, %v2380_v4 }
 0x167   : > { %v616_v34 = vmul.f32 0.2, %v581_v33 }
 0x169   : > { %v632_v36 = vmax.f32 %v581_v33, %v616_v34  ;;  %v809_v34 = vpop.permute.xlu1 %808 }
 0x16b   : > { %693 = vmatmul.f32.gmra.mxu2 %v632_v36 }
 0x16c   : > { %v583_v37 = vpop.f32.mrf.mxu1 }
 0x16d   : > { %v584_v38 = vadd.f32 %v583_v37, %v2380_v4 }
 0x16f   : > { %v617_v39 = vmul.f32 0.2, %v584_v38 }
 0x171   : > { %v633_v41 = vmax.f32 %v584_v38, %v617_v39  ;;  %v732_v38 = vld [vmem:[%s2386_s12 + $0x40] sm:$0xff] }
 0x173   : > { %696 = vmatmul.f32.gmra.mxu2 %v633_v41 }
 0x174   : > { %v586_v42 = vpop.f32.mrf.mxu1 }
 0x175   : > { %v587_v43 = vadd.f32 %v586_v42, %v2380_v4 }
 0x177   : > { %v618_v44 = vmul.f32 0.2, %v587_v43 }
 0x179   : > { %v634_v46 = vmax.f32 %v587_v43, %v618_v44  ;;  %v811_v43 = vpop.permute.xlu1 %810 }
 0x17b   : > { %699 = vmatmul.f32.gmra.mxu2 %v634_v46  ;;  %v733_v46 = vld [vmem:[%s2386_s12 + $0x48] sm:$0xff] }
 0x17c   : > { %v589_v47 = vpop.f32.mrf.mxu1 }
 0x17d   : > { %v590_v50 = vadd.f32 %v589_v47, %v2380_v4 }
 0x17f   : > { %v619_v51 = vmul.f32 0.2, %v590_v50 }
 0x181   : > { %v635_v52 = vmax.f32 %v590_v50, %v619_v51 }
 0x183   : > { %702 = vmatmul.f32.gmra.mxu2 %v635_v52  ;;  %v813_v52 = vpop.permute.xlu2 %812 }
 0x184   : > { %v592_v53 = vpop.f32.mrf.mxu1 }
 0x185   : > { %v593_v54 = vadd.f32 %v592_v53, %v2380_v4 }
 0x187   : > { %v620_v55 = vmul.f32 0.2, %v593_v54 }
 0x189   : > { %v636_v56 = vmax.f32 %v593_v54, %v620_v55 }
 0x18b   : > { %705 = vmatmul.f32.gmra.mxu2 %v636_v56  ;;  %v734_v56 = vld [vmem:[%s2386_s12 + $0x50] sm:$0xff] }
 0x18c   : > { %v595_v57 = vpop.f32.mrf.mxu1 }
 0x18d   : > { %v596_v58 = vadd.f32 %v595_v57, %v2380_v4 }
 0x18f   : > { %v621_v59 = vmul.f32 0.2, %v596_v58 }
 0x191   : > { %v637_v60 = vmax.f32 %v596_v58, %v621_v59 }
 0x193   : > { %708 = vmatmul.f32.gmra.mxu2 %v637_v60 }
 0x194   : > { %v598_v61 = vpop.f32.mrf.mxu1 }
 0x195   : > { %v599_v62 = vadd.f32 %v598_v61, %v2380_v4  ;;  %v815_v61 = vpop.permute.xlu2 %814 }
 0x197   : > { %v622_v63 = vmul.f32 0.2, %v599_v62 }
 0x199   : > { %v638_v0 = vmax.f32 %v599_v62, %v622_v63 }
 0x19b   : > { %711 = vmatmul.f32.gmra.mxu2 %v638_v0  ;;  %v735_v0 = vld [vmem:[%s2386_s12 + $0x58] sm:$0xff] }
 0x19c   : > { %v601_v1 = vpop.f32.mrf.mxu1 }
 0x19d   : > { %v602_v2 = vadd.f32 %v601_v1, %v2380_v4 }
 0x19f   : > { %v623_v3 = vmul.f32 0.2, %v602_v2 }
 0x1a1   : > { %v639_v5 = vmax.f32 %v602_v2, %v623_v3 }
 0x1a3   : > { %714 = vmatmul.f32.gmra.mxu2 %v639_v5  ;;  %v817_v5 = vpop.permute.xlu1 %816 }
 0x1a4   : > { %v604_v6 = vpop.f32.mrf.mxu1 }
 0x1a5   : > { %v605_v7 = vadd.f32 %v604_v6, %v2380_v4 }
 0x1a7   : > { %v624_v49 = vmul.f32 0.2, %v605_v7 }
 0x1a9   : > { %v640_v8 = vmax.f32 %v605_v7, %v624_v49  ;;  %v736_v7 = vld [vmem:[%s2386_s12 + $0x60] sm:$0xff] }
 0x1ab   : > { %717 = vmatmul.f32.gmra.mxu2 %v640_v8 }
 0x1ac   : > { %v607_v9 = vpop.f32.mrf.mxu1 }
 0x1ad   : > { %v608_v10 = vadd.f32 %v607_v9, %v2380_v4 }
 0x1af   : > { %v625_v11 = vmul.f32 0.2, %v608_v10 }
 0x1b1   : > { %v641_v12 = vmax.f32 %v608_v10, %v625_v11  ;;  %v737_v10 = vld [vmem:[%s2386_s12 + $0x68] sm:$0xff] }
 0x1b3   : > { %720 = vmatmul.f32.gmra.mxu2 %v641_v12 }
 0x1be   : > { %v676_v14 = vpop.f32.mrf.mxu2 }
 0x1bf   : > { %v2428_v15 = vadd.f32 %v676_v14, %v2419_v13 }
 0x1c1   : > { %v740_v16 = vmul.f32 0.5, %v2428_v15  ;;  %1615 = vst [vmem:[%s2425_s25] sm:$0xff] %v2428_v15 }
 0x1c3   : > { %v756_v4 = vmul.f32 1.442695, %v740_v16 }
 0x1c5   : > { %1917 = vpow2.f32 %v756_v4  ;;  %v951_v4 = vld [vmem:[%s2875_s5 + $0x18] sm:$0xff] }
 0x1c6   : > { %v679_v17 = vpop.f32.mrf.mxu2  ;;  %1014 = vmatpush.msrb.mxu2 %v951_v4  ;;  %1869 = vmatpush.msra.mxu3 %v951_v4 }
 0x1c7   : > { %v2434_v18 = vadd.f32 %v679_v17, %v2419_v13 }
 0x1c9   : > { %v741_v20 = vmul.f32 0.5, %v2434_v18  ;;  %1616 = vst [vmem:[%s2425_s25 + $0x8] sm:$0xff] %v2434_v18 }
 0x1cb   : > { %v1918_v21 = vpop.eup %1917  ;;  %v758_v22 = vmul.f32 1.442695, %v741_v20  ;;  %v950_v20 = vld [vmem:[%s2875_s5 + $0x10] sm:$0xff] }
 0x1cc   : > { %v852_v23 = vmul.f32 %v1918_v21, %v805_v19  ;;  %v949_v21 = vld [vmem:[%s2875_s5 + $0x8] sm:$0xff]  ;;  %1015 = vmatpush.msrb.mxu2 %v950_v20  ;;  %1870 = vmatpush.msra.mxu3 %v950_v20 }
 0x1cd   : > { %1919 = vpow2.f32 %v758_v22 }
 0x1ce   : > { %v682_v24 = vpop.f32.mrf.mxu2  ;;  %884 = vrot.lane.b32.xlu0 %v852_v23, %s2079_s11  ;;  %1016 = vmatpush.msrb.mxu2 %v949_v21 }
 0x1cf   : > { %v2441_v25 = vadd.f32 %v682_v24, %v2419_v13  ;;  %1871 = vmatpush.msra.mxu3 %v949_v21  ;;  %v948_v24 = vld [vmem:[%s2875_s5] sm:$0xff] }
 0x1d0   : > { %1017 = vmatpush.msrb.mxu2 %v948_v24 }
 0x1d1   : > { %v742_v26 = vmul.f32 0.5, %v2441_v25  ;;  %1617 = vst [vmem:[%s2425_s25 + $0x10] sm:$0xff] %v2441_v25  ;;  %1872 = vmatpush.msra.mxu3 %v948_v24 }
 0x1d3   : > { %v1920_v28 = vpop.eup %1919  ;;  %v760_v29 = vmul.f32 1.442695, %v742_v26 }
 0x1d4   : > { %v853_v31 = vmul.f32 %v1920_v28, %v807_v27 }
 0x1d5   : > { %1921 = vpow2.f32 %v760_v29 }
 0x1d6   : > { %v685_v32 = vpop.f32.mrf.mxu2  ;;  %886 = vrot.lane.b32.xlu2 %v853_v31, %s2079_s11  ;;  %818 = vrot.lane.b32.xlu0 %v731_v30, %s2078_s18 }
 0x1d7   : > { %v2450_v33 = vadd.f32 %v685_v32, %v2419_v13 }
 0x1d9   : > { %v743_v35 = vmul.f32 0.5, %v2450_v33  ;;  %1618 = vst [vmem:[%s2425_s25 + $0x18] sm:$0xff] %v2450_v33 }
 0x1db   : > { %v1922_v36 = vpop.eup %1921  ;;  %v762_v37 = vmul.f32 1.442695, %v743_v35 }
 0x1dc   : > { %v854_v39 = vmul.f32 %v1922_v36, %v809_v34 }
 0x1dd   : > { %1923 = vpow2.f32 %v762_v37 }
 0x1de   : > { %v688_v40 = vpop.f32.mrf.mxu2  ;;  %888 = vrot.lane.b32.xlu1 %v854_v39, %s2079_s11  ;;  %820 = vrot.lane.b32.xlu2 %v732_v38, %s2078_s18 }
 0x1df   : > { %v2459_v41 = vadd.f32 %v688_v40, %v2419_v13 }
 0x1e1   : > { %v744_v42 = vmul.f32 0.5, %v2459_v41  ;;  %1619 = vst [vmem:[%s2425_s25 + $0x20] sm:$0xff] %v2459_v41 }
 0x1e3   : > { %v1924_v44 = vpop.eup %1923  ;;  %v764_v45 = vmul.f32 1.442695, %v744_v42 }
 0x1e4   : > { %v855_v47 = vmul.f32 %v1924_v44, %v811_v43  ;;  %v739_v43 = vld [vmem:[%s2386_s12 + $0x78] sm:$0xff] }
 0x1e5   : > { %1925 = vpow2.f32 %v764_v45 }
 0x1e6   : > { %v691_v50 = vpop.f32.mrf.mxu2  ;;  %822 = vrot.lane.b32.xlu1 %v733_v46, %s2078_s18  ;;  %890 = vrot.lane.b32.xlu0 %v855_v47, %s2079_s11 }
 0x1e7   : > { %v2468_v51 = vadd.f32 %v691_v50, %v2419_v13 }
 0x1e9   : > { %v745_v53 = vmul.f32 0.5, %v2468_v51  ;;  %1620 = vst [vmem:[%s2425_s25 + $0x28] sm:$0xff] %v2468_v51 }
 0x1eb   : > { %v1926_v54 = vpop.eup %1925  ;;  %v766_v55 = vmul.f32 1.442695, %v745_v53  ;;  %v738_v53 = vld [vmem:[%s2386_s12 + $0x70] sm:$0xff]  ;;  %s2080_s12 = smov 64  }
 0x1ec   : > { %v856_v57 = vmul.f32 %v1926_v54, %v813_v52 }
 0x1ed   : > { %1927 = vpow2.f32 %v766_v55 }
 0x1ee   : > { %v694_v58 = vpop.f32.mrf.mxu2  ;;  %892 = vrot.lane.b32.xlu2 %v856_v57, %s2079_s11  ;;  %824 = vrot.lane.b32.xlu0 %v734_v56, %s2078_s18 }
 0x1ef   : > { %v2477_v59 = vadd.f32 %v694_v58, %v2419_v13 }
 0x1f1   : > { %v746_v60 = vmul.f32 0.5, %v2477_v59  ;;  %1621 = vst [vmem:[%s2425_s25 + $0x30] sm:$0xff] %v2477_v59 }
 0x1f3   : > { %v1928_v62 = vpop.eup %1927  ;;  %v768_v63 = vmul.f32 1.442695, %v746_v60 }
 0x1f4   : > { %v857_v1 = vmul.f32 %v1928_v62, %v815_v61 }
 0x1f5   : > { %1929 = vpow2.f32 %v768_v63 }
 0x1f6   : > { %v697_v2 = vpop.f32.mrf.mxu2  ;;  %894 = vrot.lane.b32.xlu1 %v857_v1, %s2079_s11  ;;  %826 = vrot.lane.b32.xlu2 %v735_v0, %s2078_s18 }
 0x1f7   : > { %v2486_v3 = vadd.f32 %v697_v2, %v2419_v13 }
 0x1f9   : > { %1622 = vst [vmem:[%s2425_s25 + $0x38] sm:$0xff] %v2486_v3  ;;  %v747_v39 = vmul.f32 0.5, %v2486_v3 }
 0x1fb   : > { %v1930_v6 = vpop.eup %1929  ;;  %v770_v40 = vmul.f32 1.442695, %v747_v39 }
 0x1fc   : > { %v858_v49 = vmul.f32 %v1930_v6, %v817_v5 }
 0x1fe   : > { %v700_v8 = vpop.f32.mrf.mxu2  ;;  %828 = vrot.lane.b32.xlu1 %v736_v7, %s2078_s18  ;;  %896 = vrot.lane.b32.xlu0 %v858_v49, %s2079_s11 }
 0x1ff   : > { %v2494_v9 = vadd.f32 %v700_v8, %v2419_v13 }
 0x201   : > { %1623 = vst [vmem:[%s2425_s25 + $0x40] sm:$0xff] %v2494_v9  ;;  %v748_v28 = vmul.f32 0.5, %v2494_v9 }
 0x203   : > { %v772_v29 = vmul.f32 1.442695, %v748_v28 }
 0x205   : > { %1931 = vpow2.f32 %v772_v29 }
 0x206   : > { %v703_v11 = vpop.f32.mrf.mxu2  ;;  %830 = vrot.lane.b32.xlu0 %v737_v10, %s2078_s18  ;;  %1933 = vpow2.f32 %v770_v40 }
 0x207   : > { %v2501_v12 = vadd.f32 %v703_v11, %v2419_v13 }
 0x209   : > { %1624 = vst [vmem:[%s2425_s25 + $0x48] sm:$0xff] %v2501_v12  ;;  %v749_v50 = vmul.f32 0.5, %v2501_v12 }
 0x20b   : > { %v1932_v36 = vpop.eup %1931  ;;  %v774_v52 = vmul.f32 1.442695, %v749_v50  ;;  %v1112_v50 = vld [vmem:[%s2876_s6 + $0x68] sm:$0xff] }
 0x20d   : > { %1935 = vpow2.f32 %v774_v52 }
 0x20e   : > { %v706_v14 = vpop.f32.mrf.mxu2 }
 0x20f   : > { %v2506_v16 = vadd.f32 %v706_v14, %v2419_v13 }
 0x211   : > { %1625 = vst [vmem:[%s2425_s25 + $0x50] sm:$0xff] %v2506_v16  ;;  %v750_v54 = vmul.f32 0.5, %v2506_v16 }
 0x213   : > { %v776_v57 = vmul.f32 1.442695, %v750_v54  ;;  %v1110_v54 = vld [vmem:[%s2876_s6 + $0x58] sm:$0xff] }
 0x215   : > { %1937 = vpow2.f32 %v776_v57  ;;  %v1105_v57 = vld [vmem:[%s2876_s6 + $0x30] sm:$0xff] }
 0x216   : > { %v709_v17 = vpop.f32.mrf.mxu2 }
 0x217   : > { %v2514_v19 = vadd.f32 %v709_v17, %v2419_v13 }
 0x219   : > { %1626 = vst [vmem:[%s2425_s25 + $0x58] sm:$0xff] %v2514_v19 }
 0x21e   : > { %v712_v22 = vpop.f32.mrf.mxu2 }
 0x21f   : > { %v2525_v23 = vadd.f32 %v712_v22, %v2419_v13 }
 0x221   : > { %1627 = vst [vmem:[%s2425_s25 + $0x60] sm:$0xff] %v2525_v23  ;;  %v752_v8 = vmul.f32 0.5, %v2525_v23 }
 0x226   : > { %v715_v26 = vpop.f32.mrf.mxu2 }
 0x227   : > { %v2533_v27 = vadd.f32 %v715_v26, %v2419_v13 }
 0x229   : > { %1628 = vst [vmem:[%s2425_s25 + $0x68] sm:$0xff] %v2533_v27  ;;  %v753_v14 = vmul.f32 0.5, %v2533_v27 }
 0x22e   : > { %v718_v30 = vpop.f32.mrf.mxu2 }
 0x22f   : > { %v2539_v31 = vadd.f32 %v718_v30, %v2419_v13 }
 0x230   : > { %v887_v32 = vpop.permute.xlu2 %886 }
 0x231   : > { %1629 = vst [vmem:[%s2425_s25 + $0x70] sm:$0xff] %v2539_v31  ;;  %v2555_v46 = vadd.f32 %v887_v32, %v2434_v18  ;;  %v751_v18 = vmul.f32 0.5, %v2514_v19  ;;  %v754_v28 = vmul.f32 0.5, %v2539_v31 }
 0x233   : > { %v778_v58 = vmul.f32 1.442695, %v751_v18  ;;  %v1107_v18 = vld [vmem:[%s2876_s6 + $0x40] sm:$0xff] }
 0x235   : > { %1939 = vpow2.f32 %v778_v58 }
 0x236   : > { %v721_v34 = vpop.f32.mrf.mxu2 }
 0x237   : > { %v2544_v35 = vadd.f32 %v721_v34, %v2419_v13  ;;  %v1934_v13 = vpop.eup %1933 }
 0x238   : > { %v821_v37 = vpop.permute.xlu2 %820  ;;  %v1936_v60 = vpop.eup %1935 }
 0x239   : > { %1630 = vst [vmem:[%s2425_s25 + $0x78] sm:$0xff] %v2544_v35  ;;  %v860_v38 = vmul.f32 %v1932_v36, %v821_v37  ;;  %v1938_v1 = vpop.eup %1937  ;;  %v755_v32 = vmul.f32 0.5, %v2544_v35 }
 0x23b   : > { %900 = vrot.lane.b32.xlu1 %v860_v38, %s2079_s11  ;;  %v1940_v2 = vpop.eup %1939  ;;  %v786_v34 = vmul.f32 1.442695, %v755_v32 }
 0x240   : > { %v885_v42 = vpop.permute.xlu0 %884 }
 0x241   : > { %v932_v44 = vadd.f32 %v885_v42, %v2428_v15 }
 0x243   : > { %834 = vrot.lane.b32.xlu1 %v739_v43, %s2078_s18  ;;  %1831 = vmatmul.msk.f32.vlgmr.msrb.gmra.mxu2 %vm953_vm0, %v932_v44 }
 0x248   : > { %v819_v45 = vpop.permute.xlu0 %818  ;;  %v893_v56 = vpop.permute.xlu2 %892 }
 0x249   : > { %v859_v47 = vmul.f32 %v1934_v13, %v819_v45  ;;  %v936_v6 = vadd.f32 %v893_v56, %v2459_v41  ;;  %v782_v41 = vmul.f32 1.442695, %v753_v14  ;;  %v1106_v56 = vld [vmem:[%s2876_s6 + $0x38] sm:$0xff] }
 0x24b   : > { %1832 = vmatmul.msk.f32.gmra.mxu2 %vm953_vm0, %v2555_v46  ;;  %898 = vrot.lane.b32.xlu2 %v859_v47, %s2079_s11 }
 0x250   : > { %v889_v15 = vpop.permute.xlu1 %888 }
 0x251   : > { %v2564_v55 = vadd.f32 %v889_v15, %v2441_v25  ;;  %v827_v25 = vpop.permute.xlu2 %826 }
 0x252   : > { %v863_v7 = vmul.f32 %v1940_v2, %v827_v25  ;;  %v1101_v25 = vld [vmem:[%s2876_s6 + $0x10] sm:$0xff]  ;;  %v1099_v2 = vld [vmem:[%s2876_s6] sm:$0xff] }
 0x253   : > { %1833 = vmatmul.msk.f32.gmra.mxu2 %vm953_vm0, %v2564_v55  ;;  %832 = vrot.lane.b32.xlu2 %v738_v53, %s2078_s18  ;;  %v1111_v53 = vld [vmem:[%s2876_s6 + $0x60] sm:$0xff]  ;;  %s2806_s18 = scalar_lea.vmem [#allocation2], %s1824_s26 }
 0x254   : > { %s1714_s17 = sshll.u32 %s2806_s18, 4  ;;  %s1715_s17 = int_to_ptr.vmem [resolvable:$true] %s1714_s17 }
 0x258   : > { %v823_v61 = vpop.permute.xlu1 %822  ;;  %v891_v62 = vpop.permute.xlu0 %890 }
 0x259   : > { %v861_v63 = vmul.f32 %v1936_v60, %v823_v61  ;;  %v935_v0 = vadd.f32 %v891_v62, %v2450_v33  ;;  %v780_v33 = vmul.f32 1.442695, %v752_v8  ;;  %v1104_v61 = vld [vmem:[%s2876_s6 + $0x28] sm:$0xff] }
 0x25b   : > { %902 = vrot.lane.b32.xlu0 %v861_v63, %s2079_s11  ;;  %1834 = vmatmul.msk.f32.gmra.mxu2 %vm953_vm0, %v935_v0  ;;  %1941 = vpow2.f32 %v780_v33 }
 0x25c   : > { %1943 = vpow2.f32 %v782_v41 }
 0x260   : > { %v825_v5 = vpop.permute.xlu0 %824 }
 0x261   : > { %v862_v49 = vmul.f32 %v1938_v1, %v825_v5  ;;  %v1942_v4 = vpop.eup %1941  ;;  %v1100_v1 = vld [vmem:[%s2876_s6 + $0x8] sm:$0xff] }
 0x262   : > { %v1944_v24 = vpop.eup %1943 }
 0x263   : > { %906 = vrot.lane.b32.xlu0 %v863_v7, %s2079_s11  ;;  %1835 = vmatmul.msk.f32.gmra.mxu2 %vm953_vm0, %v936_v6 }
 0x264   : > { %904 = vrot.lane.b32.xlu2 %v862_v49, %s2079_s11  ;;  %v2677_v49 = vperm.slane %v2310_v48, 3 }
 0x268   : > { %v895_v10 = vpop.permute.xlu1 %894 }
 0x269   : > { %v937_v11 = vadd.f32 %v895_v10, %v2468_v51 }
 0x26b   : > { %1836 = vmatmul.msk.f32.vlgmr.msra.gmra.mxu3 %vm953_vm0, %v937_v11 }
 0x270   : > { %v829_v17 = vpop.permute.xlu1 %828  ;;  %v897_v20 = vpop.permute.xlu0 %896 }
 0x271   : > { %v864_v21 = vmul.f32 %v1942_v4, %v829_v17  ;;  %v938_v22 = vadd.f32 %v897_v20, %v2477_v59  ;;  %v784_v59 = vmul.f32 1.442695, %v754_v28 }
 0x273   : > { %908 = vrot.lane.b32.xlu1 %v864_v21, %s2079_s11  ;;  %1837 = vmatmul.msk.f32.gmra.mxu3 %vm953_vm0, %v938_v22  ;;  %1945 = vpow2.f32 %v784_v59 }
 0x274   : > { %1947 = vpow2.f32 %v786_v34 }
 0x278   : > { %v831_v26 = vpop.permute.xlu0 %830 }
 0x279   : > { %v865_v51 = vmul.f32 %v1944_v24, %v831_v26  ;;  %v1946_v36 = vpop.eup %1945 }
 0x27a   : > { %v1948_v42 = vpop.eup %1947 }
 0x27b   : > { %910 = vrot.lane.b32.xlu2 %v865_v51, %s2079_s11 }
 0x283   : > { %1631 = vrot.lane.b32.xlu2 %v932_v44, %s2080_s12  ;;  %v1113_v44 = vld [vmem:[%s2876_s6 + $0x70] sm:$0xff] }
 0x28b   : > { %1637 = vrot.lane.b32.xlu2 %v935_v0, %s2080_s12  ;;  %v1103_v0 = vld [vmem:[%s2876_s6 + $0x20] sm:$0xff] }
 0x293   : > { %1643 = vrot.lane.b32.xlu2 %v938_v22, %s2080_s12 }
 0x2a5   : > { %v899_v29 = vpop.permute.xlu2 %898 }
 0x2a6   : > { %v939_v30 = vadd.f32 %v899_v29, %v2486_v3 }
 0x2a8   : > { %1838 = vmatmul.msk.f32.gmra.mxu3 %vm953_vm0, %v939_v30 }
 0x2ad   : > { %v901_v37 = vpop.permute.xlu1 %900  ;;  %v833_v38 = vpop.permute.xlu2 %832 }
 0x2ae   : > { %v940_v39 = vadd.f32 %v901_v37, %v2494_v9  ;;  %v866_v40 = vmul.f32 %v1946_v36, %v833_v38  ;;  %v1114_v9 = vld [vmem:[%s2876_s6 + $0x78] sm:$0xff] }
 0x2af   : > { %1116 = vmatpush.msrb.mxu3 %v1114_v9 }
 0x2b0   : > { %912 = vrot.lane.b32.xlu0 %v866_v40, %s2079_s11  ;;  %1839 = vmatmul.msk.f32.gmra.mxu3 %vm953_vm0, %v940_v39 }
 0x2b1   : > { %1117 = vmatpush.msrb.mxu3 %v1113_v44 }
 0x2b3   : > { %1118 = vmatpush.msrb.mxu3 %v1112_v50 }
 0x2b5   : > { %v835_v43 = vpop.permute.xlu1 %834  ;;  %1119 = vmatpush.msrb.mxu3 %v1111_v53 }
 0x2b6   : > { %v867_v3 = vmul.f32 %v1948_v42, %v835_v43 }
 0x2b7   : > { %1120 = vmatpush.msrb.mxu3 %v1110_v54 }
 0x2b8   : > { %914 = vrot.lane.b32.xlu1 %v867_v3, %s2079_s11  ;;  %1633 = vrot.lane.b32.xlu0 %v2555_v46, %s2080_s12  ;;  %s1713_s11 = scalar_lea.hbm %s2879_s9, %s1852_s27 }
 0x2be   : > { %v905_v13 = vpop.permute.xlu2 %904 }
 0x2bf   : > { %v942_v46 = vadd.f32 %v905_v13, %v2506_v16 }
 0x2c0   : > { %1635 = vrot.lane.b32.xlu1 %v2564_v55, %s2080_s12  ;;  %1639 = vrot.lane.b32.xlu0 %v936_v6, %s2080_s12  ;;  %v1108_v55 = vld [vmem:[%s2876_s6 + $0x48] sm:$0xff] }
 0x2c6   : > { %v1019_v5 = vpop.f32.mrf.mxu2 }
 0x2c8   : > { %1641 = vrot.lane.b32.xlu1 %v937_v11, %s2080_s12  ;;  %1645 = vrot.lane.b32.xlu0 %v939_v30, %s2080_s12  ;;  %v1020_v11 = vadd.f32 %v1019_v5, %v2677_v49  ;;  %v1223_v5 = vld [vmem:[%s2877_s7 + $0x50] sm:$0xff] }
 0x2ca   : > { %v1067_v48 = vmul.f32 0.2, %v1020_v11 }
 0x2cc   : > { %v1083_v17 = vmax.f32 %v1020_v11, %v1067_v48 }
 0x2cd   : > { %v903_v45 = vpop.permute.xlu0 %902 }
 0x2ce   : > { %v941_v47 = vadd.f32 %v903_v45, %v2501_v12  ;;  %v1022_v8 = vpop.f32.mrf.mxu2 }
 0x2cf   : > { %v1023_v20 = vadd.f32 %v1022_v8, %v2677_v49  ;;  %v1221_v8 = vld [vmem:[%s2877_s7 + $0x40] sm:$0xff] }
 0x2d0   : > { %1647 = vrot.lane.b32.xlu1 %v940_v39, %s2080_s12  ;;  %1651 = vrot.lane.b32.xlu0 %v942_v46, %s2080_s12 }
 0x2d1   : > { %1649 = vrot.lane.b32.xlu2 %v941_v47, %s2080_s12  ;;  %1840 = vmatmul.msk.f32.gmra.mxu3 %vm953_vm0, %v941_v47  ;;  %v1068_v21 = vmul.f32 0.2, %v1023_v20 }
 0x2d3   : > { %v1084_v51 = vmax.f32 %v1023_v20, %v1068_v21 }
 0x2d5   : > { %v911_v52 = vpop.permute.xlu2 %910  ;;  %v907_v15 = vpop.permute.xlu0 %906 }
 0x2d6   : > { %v945_v16 = vadd.f32 %v911_v52, %v2533_v27  ;;  %v943_v12 = vadd.f32 %v907_v15, %v2514_v19  ;;  %v1109_v19 = vld [vmem:[%s2876_s6 + $0x50] sm:$0xff] }
 0x2d7   : > { %1121 = vmatpush.msrb.mxu3 %v1109_v19 }
 0x2d8   : > { %1657 = vrot.lane.b32.xlu0 %v945_v16, %s2080_s12  ;;  %1653 = vrot.lane.b32.xlu1 %v943_v12, %s2080_s12 }
 0x2d9   : > { %1841 = vmatmul.msk.f32.gmra.mxu3 %vm953_vm0, %v942_v46 }
 0x2da   : > { %1122 = vmatpush.msrb.mxu3 %v1108_v55 }
 0x2dc   : > { %1123 = vmatpush.msrb.mxu3 %v1107_v18 }
 0x2dd   : > { %v1632_v27 = vpop.permute.xlu2 %1631 }
 0x2de   : > { %1680 = vst.msk [vmem:[%s2425_s25] sm:$0xff] %vm1679_vm1, %v1632_v27  ;;  %1124 = vmatpush.msrb.mxu3 %v1106_v56  ;;  %v1228_v27 = vld [vmem:[%s2877_s7 + $0x78] sm:$0xff]  ;;  %v1227_v56 = vld [vmem:[%s2877_s7 + $0x70] sm:$0xff] }
 0x2df   : > { %1230 = vmatpush.msrb.mxu0 %v1228_v27 }
 0x2e0   : > { %1125 = vmatpush.msrb.mxu3 %v1105_v57  ;;  %v1226_v57 = vld [vmem:[%s2877_s7 + $0x68] sm:$0xff] }
 0x2e1   : > { %1842 = vmatmul.msk.f32.gmra.mxu3 %vm953_vm0, %v943_v12  ;;  %1231 = vmatpush.msrb.mxu0 %v1227_v56 }
 0x2e2   : > { %1126 = vmatpush.msrb.mxu3 %v1104_v61 }
 0x2e3   : > { %1232 = vmatpush.msrb.mxu0 %v1226_v57 }
 0x2e4   : > { %1127 = vmatpush.msrb.mxu3 %v1103_v0 }
 0x2e5   : > { %v909_v58 = vpop.permute.xlu1 %908  ;;  %v1638_v60 = vpop.permute.xlu2 %1637 }
 0x2e6   : > { %v944_v62 = vadd.f32 %v909_v58, %v2525_v23  ;;  %1683 = vst.msk [vmem:[%s2425_s25 + $0x18] sm:$0xff] %vm1679_vm1, %v1638_v60  ;;  %v1102_v23 = vld [vmem:[%s2876_s6 + $0x18] sm:$0xff] }
 0x2e7   : > { %1128 = vmatpush.msrb.mxu3 %v1102_v23  ;;  %v1224_v23 = vld [vmem:[%s2877_s7 + $0x58] sm:$0xff] }
 0x2e8   : > { %1655 = vrot.lane.b32.xlu2 %v944_v62, %s2080_s12 }
 0x2e9   : > { %1843 = vmatmul.msk.f32.gmra.mxu3 %vm953_vm0, %v944_v62 }
 0x2ea   : > { %1129 = vmatpush.msrb.mxu3 %v1101_v25 }
 0x2ec   : > { %1130 = vmatpush.msrb.mxu3 %v1100_v1 }
 0x2ed   : > { %v1644_v63 = vpop.permute.xlu2 %1643 }
 0x2ee   : > { %1686 = vst.msk [vmem:[%s2425_s25 + $0x30] sm:$0xff] %vm1679_vm1, %v1644_v63  ;;  %1131 = vmatpush.msrb.mxu3 %v1099_v2  ;;  %v1034_v37 = vpop.f32.mrf.mxu3  ;;  %v1225_v63 = vld [vmem:[%s2877_s7 + $0x60] sm:$0xff] }
 0x2ef   : > { %v1035_v13 = vadd.f32 %v1034_v37, %v2677_v49  ;;  %1233 = vmatpush.msrb.mxu0 %v1225_v63 }
 0x2f1   : > { %1844 = vmatmul.msk.f32.gmra.mxu3 %vm953_vm0, %v945_v16  ;;  %v1072_v47 = vmul.f32 0.2, %v1035_v13  ;;  %1234 = vmatpush.msrb.mxu0 %v1224_v23 }
 0x2f3   : > { %v1088_v52 = vmax.f32 %v1035_v13, %v1072_v47  ;;  %1235 = vmatpush.msrb.mxu0 %v1223_v5 }
 0x2f6   : > { %v1037_v9 = vpop.f32.mrf.mxu3 }
 0x2f7   : > { %v1038_v50 = vadd.f32 %v1037_v9, %v2677_v49  ;;  %v2775_v9 = vld [vmem:[%s2878_s8] sm:$0xff] }
 0x2f9   : > { %v1073_v15 = vmul.f32 0.2, %v1038_v50 }
 0x2fb   : > { %v1089_v53 = vmax.f32 %v1038_v50, %v1073_v15 }
 0x322   : > { %v913_v6 = vpop.permute.xlu0 %912 }
 0x323   : > { %v946_v7 = vadd.f32 %v913_v6, %v2539_v31  ;;  %v1222_v6 = vld [vmem:[%s2877_s7 + $0x48] sm:$0xff] }
 0x324   : > { %1236 = vmatpush.msrb.mxu0 %v1222_v6 }
 0x325   : > { %1659 = vrot.lane.b32.xlu1 %v946_v7, %s2080_s12  ;;  %1845 = vmatmul.msk.f32.gmra.mxu3 %vm953_vm0, %v946_v7 }
 0x326   : > { %1237 = vmatpush.msrb.mxu0 %v1221_v8 }
 0x32a   : > { %v915_v33 = vpop.permute.xlu1 %914  ;;  %v1634_v10 = vpop.permute.xlu0 %1633 }
 0x32b   : > { %v947_v14 = vadd.f32 %v915_v33, %v2544_v35  ;;  %v1650_v41 = vpop.permute.xlu2 %1649  ;;  %1681 = vst.msk [vmem:[%s2425_s25 + $0x8] sm:$0xff] %vm1679_vm1, %v1634_v10  ;;  %v1025_v35 = vpop.f32.mrf.mxu2 }
 0x32c   : > { %1689 = vst.msk [vmem:[%s2425_s25 + $0x48] sm:$0xff] %vm1679_vm1, %v1650_v41  ;;  %v1026_v26 = vadd.f32 %v1025_v35, %v2677_v49  ;;  %v1040_v46 = vpop.f32.mrf.mxu3 }
 0x32d   : > { %1661 = vrot.lane.b32.xlu2 %v947_v14, %s2080_s12  ;;  %1846 = vmatmul.msk.f32.gmra.mxu3 %vm953_vm0, %v947_v14  ;;  %v1041_v12 = vadd.f32 %v1040_v46, %v2677_v49  ;;  %s1716_s12 = sshll.u32 %s1713_s11, 4  ;;  %s1717_s12 = int_to_ptr.hbm [resolvable:$true] %s1716_s12 }
 0x32e   : > { %v1069_v59 = vmul.f32 0.2, %v1026_v26 }
 0x32f   : > { %v1074_v54 = vmul.f32 0.2, %v1041_v12 }
 0x330   : > { %v1085_v36 = vmax.f32 %v1026_v26, %v1069_v59  ;;  %v1217_v26 = vld [vmem:[%s2877_s7 + $0x20] sm:$0xff]  ;;  %v1216_v59 = vld [vmem:[%s2877_s7 + $0x18] sm:$0xff] }
 0x331   : > { %v1090_v18 = vmax.f32 %v1041_v12, %v1074_v54 }
 0x332   : > { %v1636_v31 = vpop.permute.xlu1 %1635  ;;  %v1640_v4 = vpop.permute.xlu0 %1639 }
 0x333   : > { %1682 = vst.msk [vmem:[%s2425_s25 + $0x10] sm:$0xff] %vm1679_vm1, %v1636_v31  ;;  %v1028_v28 = vpop.f32.mrf.mxu2 }
 0x334   : > { %1684 = vst.msk [vmem:[%s2425_s25 + $0x20] sm:$0xff] %vm1679_vm1, %v1640_v4  ;;  %v1029_v32 = vadd.f32 %v1028_v28, %v2677_v49  ;;  %v1043_v16 = vpop.f32.mrf.mxu3  ;;  %v1220_v4 = vld [vmem:[%s2877_s7 + $0x38] sm:$0xff] }
 0x335   : > { %1132 = vmatmul.f32.vlgmr.msrb.gmra.mxu3 %v1083_v17  ;;  %v1044_v55 = vadd.f32 %v1043_v16, %v2677_v49  ;;  %v1219_v17 = vld [vmem:[%s2877_s7 + $0x30] sm:$0xff]  ;;  %1238 = vmatpush.msrb.mxu0 %v1220_v4 }
 0x336   : > { %v1070_v38 = vmul.f32 0.2, %v1029_v32 }
 0x337   : > { %v1075_v58 = vmul.f32 0.2, %v1044_v55  ;;  %1239 = vmatpush.msrb.mxu0 %v1219_v17 }
 0x338   : > { %v1086_v3 = vmax.f32 %v1029_v32, %v1070_v38  ;;  %v1214_v32 = vld [vmem:[%s2877_s7 + $0x8] sm:$0xff] }
 0x339   : > { %v1091_v62 = vmax.f32 %v1044_v55, %v1075_v58 }
 0x33a   : > { %v1642_v22 = vpop.permute.xlu1 %1641  ;;  %v1646_v24 = vpop.permute.xlu0 %1645 }
 0x33b   : > { %1685 = vst.msk [vmem:[%s2425_s25 + $0x28] sm:$0xff] %vm1679_vm1, %v1642_v22  ;;  %v1031_v39 = vpop.f32.mrf.mxu2 }
 0x33c   : > { %1687 = vst.msk [vmem:[%s2425_s25 + $0x38] sm:$0xff] %vm1679_vm1, %v1646_v24  ;;  %v1032_v42 = vadd.f32 %v1031_v39, %v2677_v49  ;;  %v1218_v24 = vld [vmem:[%s2877_s7 + $0x28] sm:$0xff] }
 0x33d   : > { %1135 = vmatmul.f32.gmra.mxu3 %v1084_v51  ;;  %1240 = vmatpush.msrb.mxu0 %v1218_v24 }
 0x33e   : > { %v1071_v44 = vmul.f32 0.2, %v1032_v42 }
 0x33f   : > { %1241 = vmatpush.msrb.mxu0 %v1217_v26 }
 0x340   : > { %v1087_v45 = vmax.f32 %v1032_v42, %v1071_v44  ;;  %v2778_v44 = vperm.slane %v2775_v9, 4 }
 0x341   : > { %1242 = vmatpush.msrb.mxu0 %v1216_v59 }
 0x342   : > { %v1648_v29 = vpop.permute.xlu1 %1647  ;;  %v1656_v30 = vpop.permute.xlu2 %1655 }
 0x343   : > { %1688 = vst.msk [vmem:[%s2425_s25 + $0x40] sm:$0xff] %vm1679_vm1, %v1648_v29  ;;  %v1652_v34 = vpop.permute.xlu0 %1651 }
 0x344   : > { %1692 = vst.msk [vmem:[%s2425_s25 + $0x60] sm:$0xff] %vm1679_vm1, %v1656_v30  ;;  %v1215_v30 = vld [vmem:[%s2877_s7 + $0x10] sm:$0xff] }
 0x345   : > { %1690 = vst.msk [vmem:[%s2425_s25 + $0x50] sm:$0xff] %vm1679_vm1, %v1652_v34  ;;  %1138 = vmatmul.f32.gmra.mxu3 %v1085_v36  ;;  %1243 = vmatpush.msrb.mxu0 %v1215_v30  ;;  %v1213_v34 = vld [vmem:[%s2877_s7] sm:$0xff] }
 0x347   : > { %1244 = vmatpush.msrb.mxu0 %v1214_v32 }
 0x349   : > { %1245 = vmatpush.msrb.mxu0 %v1213_v34 }
 0x34a   : > { %v1654_v40 = vpop.permute.xlu1 %1653 }
 0x34b   : > { %1691 = vst.msk [vmem:[%s2425_s25 + $0x58] sm:$0xff] %vm1679_vm1, %v1654_v40  ;;  %v1658_v43 = vpop.permute.xlu0 %1657 }
 0x34c   : > { %1693 = vst.msk [vmem:[%s2425_s25 + $0x68] sm:$0xff] %vm1679_vm1, %v1658_v43 }
 0x34d   : > { %1141 = vmatmul.f32.gmra.mxu3 %v1086_v3 }
 0x354   : > { %v1046_v19 = vpop.f32.mrf.mxu3 }
 0x355   : > { %1144 = vmatmul.f32.gmra.mxu3 %v1087_v45  ;;  %v1047_v61 = vadd.f32 %v1046_v19, %v2677_v49 }
 0x357   : > { %v1076_v0 = vmul.f32 0.2, %v1047_v61 }
 0x359   : > { %v1092_v1 = vmax.f32 %v1047_v61, %v1076_v0 }
 0x35c   : > { %v1049_v60 = vpop.f32.mrf.mxu3 }
 0x35d   : > { %1147 = vmatmul.f32.gmra.mxu3 %v1088_v52  ;;  %v1050_v25 = vadd.f32 %v1049_v60, %v2677_v49 }
 0x35f   : > { %v1077_v7 = vmul.f32 0.2, %v1050_v25 }
 0x361   : > { %v1093_v10 = vmax.f32 %v1050_v25, %v1077_v7 }
 0x364   : > { %v1052_v2 = vpop.f32.mrf.mxu3 }
 0x365   : > { %1150 = vmatmul.f32.gmra.mxu3 %v1089_v53  ;;  %v1053_v33 = vadd.f32 %v1052_v2, %v2677_v49 }
 0x367   : > { %v1078_v14 = vmul.f32 0.2, %v1053_v33 }
 0x369   : > { %v1094_v31 = vmax.f32 %v1053_v33, %v1078_v14 }
 0x36c   : > { %v1055_v11 = vpop.f32.mrf.mxu3 }
 0x36d   : > { %1153 = vmatmul.f32.gmra.mxu3 %v1090_v18  ;;  %v1056_v48 = vadd.f32 %v1055_v11, %v2677_v49 }
 0x36f   : > { %v1079_v20 = vmul.f32 0.2, %v1056_v48 }
 0x371   : > { %v1095_v22 = vmax.f32 %v1056_v48, %v1079_v20 }
 0x374   : > { %v1058_v35 = vpop.f32.mrf.mxu3 }
 0x375   : > { %1156 = vmatmul.f32.gmra.mxu3 %v1091_v62  ;;  %v1059_v21 = vadd.f32 %v1058_v35, %v2677_v49 }
 0x377   : > { %v1080_v51 = vmul.f32 0.2, %v1059_v21 }
 0x379   : > { %v1096_v29 = vmax.f32 %v1059_v21, %v1080_v51 }
 0x37d   : > { %1159 = vmatmul.f32.gmra.mxu3 %v1092_v1 }
 0x385   : > { %1162 = vmatmul.f32.gmra.mxu3 %v1093_v10 }
 0x387   : > { %v1662_v41 = vpop.permute.xlu2 %1661 }
 0x388   : > { %1695 = vst.msk [vmem:[%s2425_s25 + $0x78] sm:$0xff] %vm1679_vm1, %v1662_v41 }
 0x38d   : > { %1165 = vmatmul.f32.gmra.mxu3 %v1094_v31 }
 0x395   : > { %1168 = vmatmul.f32.gmra.mxu3 %v1095_v22 }
 0x397   : > { %v1660_v28 = vpop.permute.xlu1 %1659 }
 0x398   : > { %1694 = vst.msk [vmem:[%s2425_s25 + $0x70] sm:$0xff] %vm1679_vm1, %v1660_v28  ;;  %s2028_s25 = sshra.s32 %s1717_s12, 4  ;;  %s2029_s25 = int_to_ptr.hbm [resolvable:$true] %s2028_s25 }
 0x399   : > { %s2030_s20 = scalar_lea.hbm %s2029_s25, 128  ;;  %p2035_p0 = scmp.lt.s32.totalorder %s2029_s25, %s2879_s9 }
 0x39a   : > { %p2031_p11 = scmp.ne.s32.totalorder %s2029_s25, %s2030_s20  ;;  %p2036_p1 = scmp.lt.s32.totalorder %s2034_s30, %s2030_s20 }
 0x39c   : > { %p2032_p12 = pnand %p2031_p11, %p2176_p5  ;;  %p2037_p2 = por %p2036_p1, %p2035_p0 }
 0x39d   : > { %1171 = vmatmul.f32.gmra.mxu3 %v1096_v29 }
 0x39e   : > { %p2033_p13 = pneg %p2032_p12 }
 0x3a0   : > { %p2038_p3 = pnand %p2037_p2, %p2033_p13 }
 0x3a8   : > { %v1061_v36 = vpop.f32.mrf.mxu3 }
 0x3a9   : > { %v1062_v37 = vadd.f32 %v1061_v36, %v2677_v49 }
 0x3ab   : > { %v1081_v38 = vmul.f32 0.2, %v1062_v37 }
 0x3ad   : > { %v1097_v39 = vmax.f32 %v1062_v37, %v1081_v38 }
 0x3af   : > { %1174 = vmatmul.f32.gmra.mxu3 %v1097_v39 }
 0x3b0   : > { %v1064_v40 = vpop.f32.mrf.mxu3 }
 0x3b1   : > { %v1065_v42 = vadd.f32 %v1064_v40, %v2677_v49 }
 0x3b3   : > { %v1082_v43 = vmul.f32 0.2, %v1065_v42 }
 0x3b5   : > { %v1098_v3 = vmax.f32 %v1065_v42, %v1082_v43  ;;  %v2796_v43 = vperm.slane %v2775_v9, 5 }
 0x3b7   : > { %1177 = vmatmul.f32.gmra.mxu3 %v1098_v3 }
 0x3b8   : > { %v1133_v13 = vpop.f32.mrf.mxu3 }
 0x3b9   : > { %v1134_v45 = vadd.f32 %v1133_v13, %v2778_v44 }
 0x3bb   : > { %v1181_v46 = vmul.f32 0.2, %v1134_v45 }
 0x3bd   : > { %v1197_v47 = vmax.f32 %v1134_v45, %v1181_v46 }
 0x3bf   : > { %1246 = vmatmul.f32.vlgmr.msrb.gmra.mxu0 %v1197_v47 }
 0x3c0   : > { %v1136_v50 = vpop.f32.mrf.mxu3 }
 0x3c1   : > { %v1137_v49 = vadd.f32 %v1136_v50, %v2778_v44 }
 0x3c3   : > { %v1182_v52 = vmul.f32 0.2, %v1137_v49 }
 0x3c5   : > { %v1198_v15 = vmax.f32 %v1137_v49, %v1182_v52 }
 0x3c7   : > { %1249 = vmatmul.f32.gmra.mxu0 %v1198_v15 }
 0x3c8   : > { %v1139_v16 = vpop.f32.mrf.mxu3 }
 0x3c9   : > { %v1140_v12 = vadd.f32 %v1139_v16, %v2778_v44 }
 0x3cb   : > { %v1183_v53 = vmul.f32 0.2, %v1140_v12 }
 0x3cd   : > { %v1199_v54 = vmax.f32 %v1140_v12, %v1183_v53 }
 0x3cf   : > { %1252 = vmatmul.f32.gmra.mxu0 %v1199_v54 }
 0x3d0   : > { %v1142_v19 = vpop.f32.mrf.mxu3 }
 0x3d1   : > { %v1143_v27 = vadd.f32 %v1142_v19, %v2778_v44 }
 0x3d3   : > { %v1184_v55 = vmul.f32 0.2, %v1143_v27 }
 0x3d5   : > { %v1200_v18 = vmax.f32 %v1143_v27, %v1184_v55 }
 0x3d7   : > { %1255 = vmatmul.f32.gmra.mxu0 %v1200_v18 }
 0x3d8   : > { %v1145_v56 = vpop.f32.mrf.mxu3 }
 0x3d9   : > { %v1146_v57 = vadd.f32 %v1145_v56, %v2778_v44 }
 0x3db   : > { %v1185_v58 = vmul.f32 0.2, %v1146_v57 }
 0x3dd   : > { %v1201_v60 = vmax.f32 %v1146_v57, %v1185_v58 }
 0x3df   : > { %1258 = vmatmul.f32.gmra.mxu0 %v1201_v60 }
 0x3e0   : > { %v1148_v61 = vpop.f32.mrf.mxu3 }
 0x3e1   : > { %v1149_v62 = vadd.f32 %v1148_v61, %v2778_v44 }
 0x3e3   : > { %v1186_v63 = vmul.f32 0.2, %v1149_v62 }
 0x3e5   : > { %v1202_v0 = vmax.f32 %v1149_v62, %v1186_v63 }
 0x3e7   : > { %1261 = vmatmul.f32.gmra.mxu0 %v1202_v0 }
 0x3e8   : > { %v1151_v23 = vpop.f32.mrf.mxu3 }
 0x3e9   : > { %v1152_v25 = vadd.f32 %v1151_v23, %v2778_v44 }
 0x3eb   : > { %v1187_v1 = vmul.f32 0.2, %v1152_v25 }
 0x3ed   : > { %v1203_v2 = vmax.f32 %v1152_v25, %v1187_v1 }
 0x3ef   : > { %1264 = vmatmul.f32.gmra.mxu0 %v1203_v2 }
 0x3f0   : > { %v1154_v5 = vpop.f32.mrf.mxu3 }
 0x3f1   : > { %v1155_v6 = vadd.f32 %v1154_v5, %v2778_v44 }
 0x3f3   : > { %v1188_v7 = vmul.f32 0.2, %v1155_v6 }
 0x3f5   : > { %v1204_v8 = vmax.f32 %v1155_v6, %v1188_v7 }
 0x3f7   : > { %1267 = vmatmul.f32.gmra.mxu0 %v1204_v8 }
 0x3f8   : > { %v1157_v33 = vpop.f32.mrf.mxu3 }
 0x3f9   : > { %v1158_v10 = vadd.f32 %v1157_v33, %v2778_v44 }
 0x3fb   : > { %v1189_v11 = vmul.f32 0.2, %v1158_v10 }
 0x3fd   : > { %v1205_v14 = vmax.f32 %v1158_v10, %v1189_v11 }
 0x3ff   : > { %1270 = vmatmul.f32.gmra.mxu0 %v1205_v14 }
 0x400   : > { %v1160_v41 = vpop.f32.mrf.mxu3 }
 0x401   : > { %v1161_v48 = vadd.f32 %v1160_v41, %v2778_v44 }
 0x403   : > { %v1190_v31 = vmul.f32 0.2, %v1161_v48 }
 0x405   : > { %v1206_v4 = vmax.f32 %v1161_v48, %v1190_v31 }
 0x407   : > { %1273 = vmatmul.f32.gmra.mxu0 %v1206_v4 }
 0x408   : > { %v1163_v17 = vpop.f32.mrf.mxu3 }
 0x409   : > { %v1164_v20 = vadd.f32 %v1163_v17, %v2778_v44 }
 0x40b   : > { %v1191_v35 = vmul.f32 0.2, %v1164_v20 }
 0x40d   : > { %v1207_v21 = vmax.f32 %v1164_v20, %v1191_v35 }
 0x40f   : > { %1276 = vmatmul.f32.gmra.mxu0 %v1207_v21 }
 0x410   : > { %v1166_v22 = vpop.f32.mrf.mxu3 }
 0x411   : > { %v1167_v24 = vadd.f32 %v1166_v22, %v2778_v44 }
 0x413   : > { %v1192_v26 = vmul.f32 0.2, %v1167_v24 }
 0x415   : > { %v1208_v51 = vmax.f32 %v1167_v24, %v1192_v26 }
 0x417   : > { %1279 = vmatmul.f32.gmra.mxu0 %v1208_v51 }
 0x418   : > { %v1169_v28 = vpop.f32.mrf.mxu3 }
 0x419   : > { %v1170_v59 = vadd.f32 %v1169_v28, %v2778_v44 }
 0x41b   : > { %v1193_v29 = vmul.f32 0.2, %v1170_v59 }
 0x41d   : > { %v1209_v30 = vmax.f32 %v1170_v59, %v1193_v29 }
 0x41f   : > { %1282 = vmatmul.f32.gmra.mxu0 %v1209_v30 }
 0x420   : > { %v1172_v32 = vpop.f32.mrf.mxu3 }
 0x421   : > { %v1173_v34 = vadd.f32 %v1172_v32, %v2778_v44 }
 0x423   : > { %v1194_v36 = vmul.f32 0.2, %v1173_v34 }
 0x425   : > { %v1210_v37 = vmax.f32 %v1173_v34, %v1194_v36 }
 0x427   : > { %1285 = vmatmul.f32.gmra.mxu0 %v1210_v37 }
 0x432   : > { %v1175_v38 = vpop.f32.mrf.mxu3 }
 0x433   : > { %v1176_v39 = vadd.f32 %v1175_v38, %v2778_v44 }
 0x435   : > { %v1195_v40 = vmul.f32 0.2, %v1176_v39 }
 0x437   : > { %v1211_v42 = vmax.f32 %v1176_v39, %v1195_v40 }
 0x439   : > { %1288 = vmatmul.f32.gmra.mxu0 %v1211_v42 }
 0x43a   : > { %v1178_v3 = vpop.f32.mrf.mxu3 }
 0x43b   : > { %v1179_v13 = vadd.f32 %v1178_v3, %v2778_v44 }
 0x43c   : > { %v1247_v45 = vpop.f32.mrf.mxu0 }
 0x43d   : > { %v1196_v46 = vmul.f32 0.2, %v1179_v13  ;;  %v1248_v47 = vadd.f32 %v1247_v45, %v2796_v43 }
 0x43f   : > { %v1295_v50 = vsub.f32 0.0, %v1248_v47  ;;  %v1212_v49 = vmax.f32 %v1179_v13, %v1196_v46 }
 0x441   : > { %v1311_v52 = vmul.f32 1.442695, %v1295_v50  ;;  %1291 = vmatmul.f32.gmra.mxu0 %v1212_v49 }
 0x443   : > { %1949 = vpow2.f32 %v1311_v52 }
 0x444   : > { %v1250_v15 = vpop.f32.mrf.mxu0 }
 0x445   : > { %v1251_v16 = vadd.f32 %v1250_v15, %v2796_v43 }
 0x447   : > { %v1296_v12 = vsub.f32 0.0, %v1251_v16 }
 0x449   : > { %v1950_v53 = vpop.eup %1949  ;;  %v1313_v9 = vmul.f32 1.442695, %v1296_v12 }
 0x44a   : > { %v1343_v54 = vadd.f32 1.0, %v1950_v53 }
 0x44b   : > { %1951 = vpow2.f32 %v1313_v9 }
 0x44c   : > { %1953 = vrcp.f32 %v1343_v54  ;;  %v1253_v44 = vpop.f32.mrf.mxu0  ;;  %v1370_v63 = vand.u32 2147483648, %v1343_v54  ;;  %v1368_v23 = vand.u32 2147483647, %v1343_v54  ;;  %vm1364_vm3 = vweird.f32 %v1343_v54 }
 0x44d   : > { %v1254_v19 = vadd.f32 %v1253_v44, %v2796_v43 }
 0x44e   : > { %v1371_v7 = vor.u32 1.1754944e-38, %v1370_v63  ;;  %vm1369_vm5 = vcmp.eq.f32.partialorder %v1368_v23, 8.507059e+37 }
 0x44f   : > { %v1297_v27 = vsub.f32 0.0, %v1254_v19 }
 0x451   : > { %v1952_v55 = vpop.eup %1951  ;;  %v1315_v18 = vmul.f32 1.442695, %v1297_v27 }
 0x452   : > { %v1954_v56 = vpop.eup %1953  ;;  %v1344_v57 = vadd.f32 1.0, %v1952_v55 }
 0x453   : > { %v1360_v58 = vmul.f32 %v1954_v56, %v1343_v54  ;;  %1955 = vpow2.f32 %v1315_v18  ;;  %vm1365_vm2 = vweird.f32 %v1954_v56 }
 0x454   : > { %1957 = vrcp.f32 %v1344_v57  ;;  %v1256_v60 = vpop.f32.mrf.mxu0  ;;  %vm1366_vm4 = vmor %vm1364_vm3, %vm1365_vm2  ;;  %v1385_v31 = vand.u32 2147483648, %v1344_v57  ;;  %v1383_v17 = vand.u32 2147483647, %v1344_v57  ;;  %vm1379_vm7 = vweird.f32 %v1344_v57 }
 0x455   : > { %v1361_v61 = vsub.f32 1.0, %v1360_v58  ;;  %v1257_v62 = vadd.f32 %v1256_v60, %v2796_v43 }
 0x456   : > { %v1386_v26 = vor.u32 1.1754944e-38, %v1385_v31  ;;  %vm1384_vm9 = vcmp.eq.f32.partialorder %v1383_v17, 8.507059e+37 }
 0x457   : > { %v1362_v0 = vmul.f32 %v1954_v56, %v1361_v61  ;;  %v1298_v25 = vsub.f32 0.0, %v1257_v62 }
 0x459   : > { %v1956_v1 = vpop.eup %1955  ;;  %v1363_v2 = vadd.f32 %v1954_v56, %v1362_v0  ;;  %v1317_v5 = vmul.f32 1.442695, %v1298_v25 }
 0x45a   : > { %v1958_v6 = vpop.eup %1957  ;;  %v1345_v8 = vadd.f32 1.0, %v1956_v1 }
 0x45b   : > { %v1367_v33 = vsel %vm1366_vm4, %v1954_v56, %v1363_v2  ;;  %v1375_v10 = vmul.f32 %v1958_v6, %v1344_v57  ;;  %1959 = vpow2.f32 %v1317_v5  ;;  %vm1380_vm6 = vweird.f32 %v1958_v6 }
 0x45c   : > { %v1372_v11 = vsel %vm1369_vm5, %v1371_v7, %v1367_v33  ;;  %1961 = vrcp.f32 %v1345_v8  ;;  %v1259_v14 = vpop.f32.mrf.mxu0  ;;  %vm1381_vm8 = vmor %vm1379_vm7, %vm1380_vm6  ;;  %v1400_v36 = vand.u32 2147483648, %v1345_v8  ;;  %v1398_v38 = vand.u32 2147483647, %v1345_v8 }
 0x45d   : > { %1599 = vst [vmem:[%s2806_s18] sm:$0xff] %v1372_v11  ;;  %v1376_v41 = vsub.f32 1.0, %v1375_v10  ;;  %v1260_v48 = vadd.f32 %v1259_v14, %v2796_v43  ;;  %vm1394_vm11 = vweird.f32 %v1345_v8 }
 0x45e   : > { %v1401_v45 = vor.u32 1.1754944e-38, %v1400_v36  ;;  %vm1399_vm13 = vcmp.eq.f32.partialorder %v1398_v38, 8.507059e+37 }
 0x45f   : > { %v1377_v4 = vmul.f32 %v1958_v6, %v1376_v41  ;;  %v1299_v20 = vsub.f32 0.0, %v1260_v48 }
 0x461   : > { %v1960_v35 = vpop.eup %1959  ;;  %v1378_v21 = vadd.f32 %v1958_v6, %v1377_v4  ;;  %v1319_v22 = vmul.f32 1.442695, %v1299_v20 }
 0x462   : > { %v1962_v24 = vpop.eup %1961  ;;  %v1346_v51 = vadd.f32 1.0, %v1960_v35 }
 0x463   : > { %v1382_v28 = vsel %vm1381_vm8, %v1958_v6, %v1378_v21  ;;  %v1390_v59 = vmul.f32 %v1962_v24, %v1345_v8  ;;  %1963 = vpow2.f32 %v1319_v22  ;;  %vm1395_vm10 = vweird.f32 %v1962_v24 }
 0x464   : > { %v1387_v29 = vsel %vm1384_vm9, %v1386_v26, %v1382_v28  ;;  %1965 = vrcp.f32 %v1346_v51  ;;  %v1262_v30 = vpop.f32.mrf.mxu0  ;;  %vm1396_vm12 = vmor %vm1394_vm11, %vm1395_vm10  ;;  %v1415_v12 = vand.u32 2147483648, %v1346_v51  ;;  %v1413_v9 = vand.u32 2147483647, %v1346_v51 }
 0x465   : > { %1600 = vst [vmem:[%s2806_s18 + $0x8] sm:$0xff] %v1387_v29  ;;  %v1391_v32 = vsub.f32 1.0, %v1390_v59  ;;  %v1263_v34 = vadd.f32 %v1262_v30, %v2796_v43  ;;  %vm1409_vm15 = vweird.f32 %v1346_v51 }
 0x466   : > { %v1416_v18 = vor.u32 1.1754944e-38, %v1415_v12  ;;  %vm1414_vm1 = vcmp.eq.f32.partialorder %v1413_v9, 8.507059e+37 }
 0x467   : > { %v1392_v37 = vmul.f32 %v1962_v24, %v1391_v32  ;;  %v1300_v39 = vsub.f32 0.0, %v1263_v34 }
 0x469   : > { %v1964_v40 = vpop.eup %1963  ;;  %v1393_v42 = vadd.f32 %v1962_v24, %v1392_v37  ;;  %v1321_v3 = vmul.f32 1.442695, %v1300_v39 }
 0x46a   : > { %v1966_v13 = vpop.eup %1965  ;;  %v1347_v46 = vadd.f32 1.0, %v1964_v40 }
 0x46b   : > { %v1397_v47 = vsel %vm1396_vm12, %v1962_v24, %v1393_v42  ;;  %v1405_v50 = vmul.f32 %v1966_v13, %v1346_v51  ;;  %1967 = vpow2.f32 %v1321_v3  ;;  %vm1410_vm14 = vweird.f32 %v1966_v13 }
 0x46c   : > { %v1402_v49 = vsel %vm1399_vm13, %v1401_v45, %v1397_v47  ;;  %1969 = vrcp.f32 %v1347_v46  ;;  %v1265_v52 = vpop.f32.mrf.mxu0  ;;  %vm1411_vm0 = vmor %vm1409_vm15, %vm1410_vm14  ;;  %v1430_v0 = vand.u32 2147483648, %v1347_v46  ;;  %v1428_v25 = vand.u32 2147483647, %v1347_v46 }
 0x46d   : > { %1601 = vst [vmem:[%s2806_s18 + $0x10] sm:$0xff] %v1402_v49  ;;  %v1406_v15 = vsub.f32 1.0, %v1405_v50  ;;  %v1266_v16 = vadd.f32 %v1265_v52, %v2796_v43  ;;  %vm1424_vm3 = vweird.f32 %v1347_v46 }
 0x46e   : > { %v1431_v8 = vor.u32 1.1754944e-38, %v1430_v0  ;;  %vm1429_vm5 = vcmp.eq.f32.partialorder %v1428_v25, 8.507059e+37 }
 0x46f   : > { %v1407_v53 = vmul.f32 %v1966_v13, %v1406_v15  ;;  %v1301_v54 = vsub.f32 0.0, %v1266_v16 }
 0x471   : > { %v1968_v44 = vpop.eup %1967  ;;  %v1408_v19 = vadd.f32 %v1966_v13, %v1407_v53  ;;  %v1323_v27 = vmul.f32 1.442695, %v1301_v54 }
 0x472   : > { %v1970_v55 = vpop.eup %1969  ;;  %v1348_v56 = vadd.f32 1.0, %v1968_v44 }
 0x473   : > { %v1412_v57 = vsel %vm1411_vm0, %v1966_v13, %v1408_v19  ;;  %v1420_v58 = vmul.f32 %v1970_v55, %v1347_v46  ;;  %1971 = vpow2.f32 %v1323_v27  ;;  %vm1425_vm2 = vweird.f32 %v1970_v55 }
 0x474   : > { %v1417_v60 = vsel %vm1414_vm1, %v1416_v18, %v1412_v57  ;;  %1973 = vrcp.f32 %v1348_v56  ;;  %v1268_v61 = vpop.f32.mrf.mxu0  ;;  %vm1426_vm4 = vmor %vm1424_vm3, %vm1425_vm2  ;;  %v1445_v4 = vand.u32 2147483648, %v1348_v56  ;;  %v1443_v20 = vand.u32 2147483647, %v1348_v56 }
 0x475   : > { %1602 = vst [vmem:[%s2806_s18 + $0x18] sm:$0xff] %v1417_v60  ;;  %v1421_v62 = vsub.f32 1.0, %v1420_v58  ;;  %v1269_v63 = vadd.f32 %v1268_v61, %v2796_v43  ;;  %vm1439_vm7 = vweird.f32 %v1348_v56 }
 0x476   : > { %v1446_v51 = vor.u32 1.1754944e-38, %v1445_v4  ;;  %vm1444_vm9 = vcmp.eq.f32.partialorder %v1443_v20, 8.507059e+37 }
 0x477   : > { %v1422_v23 = vmul.f32 %v1970_v55, %v1421_v62  ;;  %v1302_v1 = vsub.f32 0.0, %v1269_v63 }
 0x479   : > { %v1972_v2 = vpop.eup %1971  ;;  %v1423_v5 = vadd.f32 %v1970_v55, %v1422_v23  ;;  %v1325_v6 = vmul.f32 1.442695, %v1302_v1 }
 0x47a   : > { %v1974_v7 = vpop.eup %1973  ;;  %v1349_v33 = vadd.f32 1.0, %v1972_v2 }
 0x47b   : > { %v1427_v10 = vsel %vm1426_vm4, %v1970_v55, %v1423_v5  ;;  %v1435_v11 = vmul.f32 %v1974_v7, %v1348_v56  ;;  %1975 = vpow2.f32 %v1325_v6  ;;  %vm1440_vm6 = vweird.f32 %v1974_v7 }
 0x47c   : > { %v1432_v14 = vsel %vm1429_vm5, %v1431_v8, %v1427_v10  ;;  %1977 = vrcp.f32 %v1349_v33  ;;  %v1271_v41 = vpop.f32.mrf.mxu0  ;;  %vm1441_vm8 = vmor %vm1439_vm7, %vm1440_vm6  ;;  %v1460_v37 = vand.u32 2147483648, %v1349_v33  ;;  %v1458_v39 = vand.u32 2147483647, %v1349_v33 }
 0x47d   : > { %1603 = vst [vmem:[%s2806_s18 + $0x20] sm:$0xff] %v1432_v14  ;;  %v1436_v48 = vsub.f32 1.0, %v1435_v11  ;;  %v1272_v31 = vadd.f32 %v1271_v41, %v2796_v43  ;;  %vm1454_vm11 = vweird.f32 %v1349_v33 }
 0x47e   : > { %v1461_v46 = vor.u32 1.1754944e-38, %v1460_v37  ;;  %vm1459_vm13 = vcmp.eq.f32.partialorder %v1458_v39, 8.507059e+37 }
 0x47f   : > { %v1437_v17 = vmul.f32 %v1974_v7, %v1436_v48  ;;  %v1303_v35 = vsub.f32 0.0, %v1272_v31 }
 0x481   : > { %v1976_v21 = vpop.eup %1975  ;;  %v1438_v22 = vadd.f32 %v1974_v7, %v1437_v17  ;;  %v1327_v24 = vmul.f32 1.442695, %v1303_v35 }
 0x482   : > { %v1978_v26 = vpop.eup %1977  ;;  %v1350_v28 = vadd.f32 1.0, %v1976_v21 }
 0x483   : > { %v1442_v59 = vsel %vm1441_vm8, %v1974_v7, %v1438_v22  ;;  %v1450_v29 = vmul.f32 %v1978_v26, %v1349_v33  ;;  %1979 = vpow2.f32 %v1327_v24  ;;  %vm1455_vm10 = vweird.f32 %v1978_v26 }
 0x484   : > { %v1447_v30 = vsel %vm1444_vm9, %v1446_v51, %v1442_v59  ;;  %1981 = vrcp.f32 %v1350_v28  ;;  %v1274_v32 = vpop.f32.mrf.mxu0  ;;  %vm1456_vm12 = vmor %vm1454_vm11, %vm1455_vm10  ;;  %v1475_v53 = vand.u32 2147483648, %v1350_v28  ;;  %v1473_v54 = vand.u32 2147483647, %v1350_v28 }
 0x485   : > { %1604 = vst [vmem:[%s2806_s18 + $0x28] sm:$0xff] %v1447_v30  ;;  %v1451_v34 = vsub.f32 1.0, %v1450_v29  ;;  %v1275_v36 = vadd.f32 %v1274_v32, %v2796_v43  ;;  %vm1469_vm15 = vweird.f32 %v1350_v28 }
 0x486   : > { %v1476_v56 = vor.u32 1.1754944e-38, %v1475_v53  ;;  %vm1474_vm1 = vcmp.eq.f32.partialorder %v1473_v54, 8.507059e+37 }
 0x487   : > { %v1452_v38 = vmul.f32 %v1978_v26, %v1451_v34  ;;  %v1304_v40 = vsub.f32 0.0, %v1275_v36 }
 0x489   : > { %v1980_v42 = vpop.eup %1979  ;;  %v1453_v3 = vadd.f32 %v1978_v26, %v1452_v38  ;;  %v1329_v13 = vmul.f32 1.442695, %v1304_v40 }
 0x48a   : > { %v1982_v45 = vpop.eup %1981  ;;  %v1351_v47 = vadd.f32 1.0, %v1980_v42 }
 0x48b   : > { %v1457_v50 = vsel %vm1456_vm12, %v1978_v26, %v1453_v3  ;;  %v1465_v49 = vmul.f32 %v1982_v45, %v1350_v28  ;;  %1983 = vpow2.f32 %v1329_v13  ;;  %vm1470_vm14 = vweird.f32 %v1982_v45 }
 0x48c   : > { %v1462_v52 = vsel %vm1459_vm13, %v1461_v46, %v1457_v50  ;;  %1985 = vrcp.f32 %v1351_v47  ;;  %v1277_v15 = vpop.f32.mrf.mxu0  ;;  %vm1471_vm0 = vmor %vm1469_vm15, %vm1470_vm14  ;;  %v1490_v23 = vand.u32 2147483648, %v1351_v47  ;;  %v1488_v1 = vand.u32 2147483647, %v1351_v47 }
 0x48d   : > { %1605 = vst [vmem:[%s2806_s18 + $0x30] sm:$0xff] %v1462_v52  ;;  %v1466_v16 = vsub.f32 1.0, %v1465_v49  ;;  %v1278_v12 = vadd.f32 %v1277_v15, %v2796_v43  ;;  %vm1484_vm3 = vweird.f32 %v1351_v47 }
 0x48e   : > { %v1491_v33 = vor.u32 1.1754944e-38, %v1490_v23  ;;  %vm1489_vm5 = vcmp.eq.f32.partialorder %v1488_v1, 8.507059e+37 }
 0x48f   : > { %v1467_v9 = vmul.f32 %v1982_v45, %v1466_v16  ;;  %v1305_v44 = vsub.f32 0.0, %v1278_v12 }
 0x491   : > { %v1984_v19 = vpop.eup %1983  ;;  %v1468_v27 = vadd.f32 %v1982_v45, %v1467_v9  ;;  %v1331_v55 = vmul.f32 1.442695, %v1305_v44 }
 0x492   : > { %v1986_v18 = vpop.eup %1985  ;;  %v1352_v57 = vadd.f32 1.0, %v1984_v19 }
 0x493   : > { %v1472_v58 = vsel %vm1471_vm0, %v1982_v45, %v1468_v27  ;;  %v1480_v60 = vmul.f32 %v1986_v18, %v1351_v47  ;;  %1987 = vpow2.f32 %v1331_v55  ;;  %vm1485_vm2 = vweird.f32 %v1986_v18 }
 0x494   : > { %v1477_v61 = vsel %vm1474_vm1, %v1476_v56, %v1472_v58  ;;  %1989 = vrcp.f32 %v1352_v57  ;;  %v1280_v62 = vpop.f32.mrf.mxu0  ;;  %vm1486_vm4 = vmor %vm1484_vm3, %vm1485_vm2  ;;  %v1505_v17 = vand.u32 2147483648, %v1352_v57  ;;  %v1503_v35 = vand.u32 2147483647, %v1352_v57 }
 0x495   : > { %1606 = vst [vmem:[%s2806_s18 + $0x38] sm:$0xff] %v1477_v61  ;;  %v1481_v63 = vsub.f32 1.0, %v1480_v60  ;;  %v1281_v0 = vadd.f32 %v1280_v62, %v2796_v43  ;;  %vm1499_vm7 = vweird.f32 %v1352_v57 }
 0x496   : > { %v1506_v28 = vor.u32 1.1754944e-38, %v1505_v17  ;;  %vm1504_vm9 = vcmp.eq.f32.partialorder %v1503_v35, 8.507059e+37 }
 0x497   : > { %v1482_v25 = vmul.f32 %v1986_v18, %v1481_v63  ;;  %v1306_v2 = vsub.f32 0.0, %v1281_v0 }
 0x499   : > { %v1988_v5 = vpop.eup %1987  ;;  %v1483_v6 = vadd.f32 %v1986_v18, %v1482_v25  ;;  %v1333_v7 = vmul.f32 1.442695, %v1306_v2 }
 0x49a   : > { %v1990_v8 = vpop.eup %1989  ;;  %v1353_v10 = vadd.f32 1.0, %v1988_v5 }
 0x49b   : > { %v1487_v11 = vsel %vm1486_vm4, %v1986_v18, %v1483_v6  ;;  %v1495_v14 = vmul.f32 %v1990_v8, %v1352_v57  ;;  %1991 = vpow2.f32 %v1333_v7  ;;  %vm1500_vm6 = vweird.f32 %v1990_v8 }
 0x49c   : > { %v1492_v41 = vsel %vm1489_vm5, %v1491_v33, %v1487_v11  ;;  %1993 = vrcp.f32 %v1353_v10  ;;  %v1283_v48 = vpop.f32.mrf.mxu0  ;;  %vm1501_vm8 = vmor %vm1499_vm7, %vm1500_vm6  ;;  %v1520_v38 = vand.u32 2147483648, %v1353_v10  ;;  %v1518_v40 = vand.u32 2147483647, %v1353_v10 }
 0x49d   : > { %1607 = vst [vmem:[%s2806_s18 + $0x40] sm:$0xff] %v1492_v41  ;;  %v1496_v31 = vsub.f32 1.0, %v1495_v14  ;;  %v1284_v4 = vadd.f32 %v1283_v48, %v2796_v43  ;;  %vm1514_vm11 = vweird.f32 %v1353_v10 }
 0x49e   : > { %v1521_v47 = vor.u32 1.1754944e-38, %v1520_v38  ;;  %vm1519_vm13 = vcmp.eq.f32.partialorder %v1518_v40, 8.507059e+37 }
 0x49f   : > { %v1497_v20 = vmul.f32 %v1990_v8, %v1496_v31  ;;  %v1307_v21 = vsub.f32 0.0, %v1284_v4 }
 0x4a1   : > { %v1992_v22 = vpop.eup %1991  ;;  %v1498_v24 = vadd.f32 %v1990_v8, %v1497_v20  ;;  %v1335_v26 = vmul.f32 1.442695, %v1307_v21 }
 0x4a2   : > { %v1994_v51 = vpop.eup %1993  ;;  %v1354_v59 = vadd.f32 1.0, %v1992_v22 }
 0x4a3   : > { %v1502_v29 = vsel %vm1501_vm8, %v1990_v8, %v1498_v24  ;;  %v1510_v30 = vmul.f32 %v1994_v51, %v1353_v10  ;;  %1995 = vpow2.f32 %v1335_v26  ;;  %vm1515_vm10 = vweird.f32 %v1994_v51 }
 0x4a4   : > { %v1507_v32 = vsel %vm1504_vm9, %v1506_v28, %v1502_v29  ;;  %1997 = vrcp.f32 %v1354_v59  ;;  %v1286_v34 = vpop.f32.mrf.mxu0  ;;  %vm1516_vm12 = vmor %vm1514_vm11, %vm1515_vm10  ;;  %v1535_v12 = vand.u32 2147483648, %v1354_v59  ;;  %v1533_v9 = vand.u32 2147483647, %v1354_v59 }
 0x4a5   : > { %1608 = vst [vmem:[%s2806_s18 + $0x48] sm:$0xff] %v1507_v32  ;;  %v1511_v36 = vsub.f32 1.0, %v1510_v30  ;;  %v1287_v37 = vadd.f32 %v1286_v34, %v2796_v43  ;;  %vm1529_vm15 = vweird.f32 %v1354_v59 }
 0x4a6   : > { %v1536_v27 = vor.u32 1.1754944e-38, %v1535_v12  ;;  %vm1534_vm1 = vcmp.eq.f32.partialorder %v1533_v9, 8.507059e+37 }
 0x4a7   : > { %v1512_v39 = vmul.f32 %v1994_v51, %v1511_v36  ;;  %v1308_v42 = vsub.f32 0.0, %v1287_v37 }
 0x4a9   : > { %v1996_v3 = vpop.eup %1995  ;;  %v1513_v13 = vadd.f32 %v1994_v51, %v1512_v39  ;;  %v1337_v45 = vmul.f32 1.442695, %v1308_v42 }
 0x4aa   : > { %v1998_v46 = vpop.eup %1997  ;;  %v1355_v50 = vadd.f32 1.0, %v1996_v3 }
 0x4ab   : > { %v1517_v49 = vsel %vm1516_vm12, %v1994_v51, %v1513_v13  ;;  %v1525_v52 = vmul.f32 %v1998_v46, %v1354_v59  ;;  %1999 = vpow2.f32 %v1337_v45  ;;  %vm1530_vm14 = vweird.f32 %v1998_v46 }
 0x4ac   : > { %v1522_v15 = vsel %vm1519_vm13, %v1521_v47, %v1517_v49  ;;  %2001 = vrcp.f32 %v1355_v50  ;;  %vm1531_vm0 = vmor %vm1529_vm15, %vm1530_vm14  ;;  %v1550_v60 = vand.u32 2147483648, %v1355_v50  ;;  %v1548_v63 = vand.u32 2147483647, %v1355_v50 }
 0x4ad   : > { %1609 = vst [vmem:[%s2806_s18 + $0x50] sm:$0xff] %v1522_v15  ;;  %v1526_v16 = vsub.f32 1.0, %v1525_v52  ;;  %vm1544_vm3 = vweird.f32 %v1355_v50 }
 0x4ae   : > { %v1551_v2 = vor.u32 1.1754944e-38, %v1550_v60  ;;  %vm1549_vm5 = vcmp.eq.f32.partialorder %v1548_v63, 8.507059e+37 }
 0x4af   : > { %v1527_v53 = vmul.f32 %v1998_v46, %v1526_v16 }
 0x4b1   : > { %v2000_v54 = vpop.eup %1999  ;;  %v1528_v44 = vadd.f32 %v1998_v46, %v1527_v53 }
 0x4b2   : > { %v2002_v19 = vpop.eup %2001  ;;  %v1356_v55 = vadd.f32 1.0, %v2000_v54 }
 0x4b3   : > { %v1532_v18 = vsel %vm1531_vm0, %v1998_v46, %v1528_v44  ;;  %v1540_v56 = vmul.f32 %v2002_v19, %v1355_v50  ;;  %vm1545_vm2 = vweird.f32 %v2002_v19 }
 0x4b4   : > { %v1537_v57 = vsel %vm1534_vm1, %v1536_v27, %v1532_v18  ;;  %2003 = vrcp.f32 %v1356_v55  ;;  %vm1546_vm4 = vmor %vm1544_vm3, %vm1545_vm2  ;;  %v1565_v10 = vand.u32 2147483648, %v1356_v55  ;;  %v1563_v41 = vand.u32 2147483647, %v1356_v55 }
 0x4b5   : > { %1610 = vst [vmem:[%s2806_s18 + $0x58] sm:$0xff] %v1537_v57  ;;  %v1541_v58 = vsub.f32 1.0, %v1540_v56  ;;  %vm1559_vm7 = vweird.f32 %v1356_v55 }
 0x4b6   : > { %v1289_v61 = vpop.f32.mrf.mxu0  ;;  %v1566_v17 = vor.u32 1.1754944e-38, %v1565_v10  ;;  %vm1564_vm9 = vcmp.eq.f32.partialorder %v1563_v41, 8.507059e+37 }
 0x4b7   : > { %v1542_v62 = vmul.f32 %v2002_v19, %v1541_v58  ;;  %v1290_v0 = vadd.f32 %v1289_v61, %v2796_v43 }
 0x4b9   : > { %v1543_v23 = vadd.f32 %v2002_v19, %v1542_v62  ;;  %v1309_v25 = vsub.f32 0.0, %v1290_v0 }
 0x4ba   : > { %v2004_v1 = vpop.eup %2003 }
 0x4bb   : > { %v1547_v5 = vsel %vm1546_vm4, %v2002_v19, %v1543_v23  ;;  %v1555_v6 = vmul.f32 %v2004_v1, %v1356_v55  ;;  %v1339_v7 = vmul.f32 1.442695, %v1309_v25  ;;  %vm1560_vm6 = vweird.f32 %v2004_v1 }
 0x4bc   : > { %v1552_v8 = vsel %vm1549_vm5, %v1551_v2, %v1547_v5  ;;  %vm1561_vm8 = vmor %vm1559_vm7, %vm1560_vm6 }
 0x4bd   : > { %1611 = vst [vmem:[%s2806_s18 + $0x60] sm:$0xff] %v1552_v8  ;;  %v1556_v33 = vsub.f32 1.0, %v1555_v6  ;;  %2005 = vpow2.f32 %v1339_v7 }
 0x4be   : > { %v1292_v11 = vpop.f32.mrf.mxu0 }
 0x4bf   : > { %v1557_v14 = vmul.f32 %v2004_v1, %v1556_v33  ;;  %v1293_v48 = vadd.f32 %v1292_v11, %v2796_v43 }
 0x4c1   : > { %v1558_v31 = vadd.f32 %v2004_v1, %v1557_v14  ;;  %v1310_v4 = vsub.f32 0.0, %v1293_v48 }
 0x4c3   : > { %v2006_v20 = vpop.eup %2005  ;;  %v1562_v35 = vsel %vm1561_vm8, %v2004_v1, %v1558_v31  ;;  %v1341_v21 = vmul.f32 1.442695, %v1310_v4 }
 0x4c4   : > { %v1567_v22 = vsel %vm1564_vm9, %v1566_v17, %v1562_v35  ;;  %v1357_v24 = vadd.f32 1.0, %v2006_v20 }
 0x4c5   : > { %1612 = vst [vmem:[%s2806_s18 + $0x68] sm:$0xff] %v1567_v22  ;;  %2007 = vpow2.f32 %v1341_v21 }
 0x4c6   : > { %2009 = vrcp.f32 %v1357_v24  ;;  %v1580_v29 = vand.u32 2147483648, %v1357_v24  ;;  %v1578_v32 = vand.u32 2147483647, %v1357_v24  ;;  %vm1574_vm11 = vweird.f32 %v1357_v24 }
 0x4c8   : > { %v1581_v37 = vor.u32 1.1754944e-38, %v1580_v29  ;;  %vm1579_vm13 = vcmp.eq.f32.partialorder %v1578_v32, 8.507059e+37 }
 0x4cb   : > { %v2008_v26 = vpop.eup %2007 }
 0x4cc   : > { %v2010_v51 = vpop.eup %2009  ;;  %v1358_v28 = vadd.f32 1.0, %v2008_v26 }
 0x4cd   : > { %v1570_v59 = vmul.f32 %v2010_v51, %v1357_v24  ;;  %vm1575_vm10 = vweird.f32 %v2010_v51 }
 0x4ce   : > { %2011 = vrcp.f32 %v1358_v28  ;;  %vm1576_vm12 = vmor %vm1574_vm11, %vm1575_vm10  ;;  %v1595_v3 = vand.u32 2147483648, %v1358_v28  ;;  %v1593_v45 = vand.u32 2147483647, %v1358_v28  ;;  %vm1589_vm15 = vweird.f32 %v1358_v28 }
 0x4cf   : > { %v1571_v43 = vsub.f32 1.0, %v1570_v59 }
 0x4d0   : > { %v1596_v47 = vor.u32 1.1754944e-38, %v1595_v3  ;;  %vm1594_vm1 = vcmp.eq.f32.partialorder %v1593_v45, 8.507059e+37 }
 0x4d1   : > { %v1572_v30 = vmul.f32 %v2010_v51, %v1571_v43 }
 0x4d3   : > { %v1573_v34 = vadd.f32 %v2010_v51, %v1572_v30 }
 0x4d4   : > { %v2012_v36 = vpop.eup %2011 }
 0x4d5   : > { %v1577_v38 = vsel %vm1576_vm12, %v2010_v51, %v1573_v34  ;;  %v1585_v39 = vmul.f32 %v2012_v36, %v1358_v28  ;;  %vm1590_vm14 = vweird.f32 %v2012_v36 }
 0x4d6   : > { %v1582_v40 = vsel %vm1579_vm13, %v1581_v37, %v1577_v38  ;;  %vm1591_vm0 = vmor %vm1589_vm15, %vm1590_vm14 }
 0x4d7   : > { %1613 = vst [vmem:[%s2806_s18 + $0x70] sm:$0xff] %v1582_v40  ;;  %v1586_v42 = vsub.f32 1.0, %v1585_v39 }
 0x4d9   : > { %v1587_v13 = vmul.f32 %v2012_v36, %v1586_v42 }
 0x4db   : > { %v1588_v46 = vadd.f32 %v2012_v36, %v1587_v13 }
 0x4dd   : > { %v1592_v50 = vsel %vm1591_vm0, %v2012_v36, %v1588_v46 }
 0x4de   : > { %v1597_v49 = vsel %vm1594_vm1, %v1596_v47, %v1592_v50 }
 0x4df   : > { %1614 = vst [vmem:[%s2806_s18 + $0x78] sm:$0xff] %v1597_v49 }
 0x4e0   : > { %2041 = shalt.err (!%p2038_p3)
}
 0x4e1   : > { %s2081_s21 = smov 128   ;;  %s2082_s18 = smov 8  }
 0x4e2   : > { %1873 = dma.vmem_to_hbm [thread:$0]  (%p2176_p5), %s1715_s17, 2048, %s1717_s12, %s1697_s29, %s2081_s21, %s2081_s21, %s2082_s18  }
 0x4e3 PF: > { %p1879_p4 = scmp.ge.s32.totalorder %s2076_s16, 2  ;;  %s1735_s26 = sand.u32 1, %s2064_s13  }
 0x4e4   : > { %s1736_s27 = scalar_lea.sflag [#allocation3], %s1735_s26 }
 0x4e5   : > { %p1876_p7 = pnand %p1879_p4, %p2180_p6 }
 0x4e7   : > { %p1877_p8 = pneg %p1876_p7 }
 0x4e9   : > { %2059 = dma.done.wait (%p1877_p8), %s1736_s27, 2048  }
 0x4ea   : > { %2061 = vsyncadd (%p1877_p8), %s1736_s27, 4294965248  ;;  %p21_p9 = scmp.ge.s32.totalorder %s2163_s19, 4   ;;  %s2883_s13 = smov %s2068_s14 }
 0x4eb   : > { %s2884_s14 = smov %s2072_s15  ;;  %s2885_s15 = smov %s2174_s22 }
 0x4ec   : > { %s2886_s16 = smov %s2163_s19  ;;  %23 = sbr.rel (!%p21_p9) target bundleno = 3 (0x3), region = 106 }
 0x4f1   :  { %1750 = vsyncpa [#allocation3], 1 }
 0x4f2   :  { %1752 = vsyncpa [#allocation3 + $0x1], 1 }

</bundles_post_ra>
